<compile_context>
chip_gen: v6e
topology: v6e:2x2x1
jax: 0.10.0
libtpu: 0.0.40
codegen_flags: <defaults>
</compile_context>

<pallas_src>
import functools

import jax
import jax.numpy as jnp
from jax import lax
from jax.experimental import pallas as pl
from jax.experimental.pallas import tpu as pltpu

KH, KW = 3, 3  # 3x3 conv, stride 1, SAME padding


def _round_up(x, m):
    return (x + m - 1) // m * m


def _matmul_bias_relu_kernel(x_ref, w_ref, b_ref, o_ref):
    """One block of TB frames per grid step, already im2col'ed.

    x_ref : (TB*H*W, K_pad)   bf16 patch rows (lane-dense, K_pad = 128k)  (VMEM)
    w_ref : (K_pad, Cout_p)   bf16 packed conv weights                    (VMEM)
    b_ref : (1, Cout_p)       f32 bias                                    (VMEM)
    o_ref : (TB*H*W, Cout_p)  bf16 output rows (128 lanes, single store)  (VMEM)
    """
    acc = jnp.dot(x_ref[...], w_ref[...], preferred_element_type=jnp.float32)
    o_ref[...] = jnp.maximum(acc + b_ref[...], 0.0).astype(o_ref.dtype)


def conv2d_relu_pallas(x_nhwc, weight_hwio, bias, *, frames_per_block=32):
    """x_nhwc: (B, H, W, Cin) -> (B, H, W, Cout) bf16, 3x3 SAME conv + ReLU."""
    B, H, W, Cin = x_nhwc.shape
    Cout = weight_hwio.shape[-1]

    K = KH * KW * Cin
    K_pad = _round_up(K, 128)          # MXU contraction depth / lane-dense LHS
    Cout_p = _round_up(Cout, 128)      # lane-dense output / MXU N dim

    # Frames per grid step: big enough to amortize per-step overhead, but keep
    # at least 2 grid steps so the parallel grid axis can shard across the two
    # v7x TensorCores.
    TB = max(1, min(frames_per_block, B))
    if B > 1 and pl.cdiv(B, TB) < 2:
        TB = pl.cdiv(B, 2)
    B_pad = _round_up(B, TB)

    # Halo pad + batch round-up + single cast to bf16.
    xh = jnp.pad(x_nhwc,
                 ((0, B_pad - B), (1, 1), (1, 1), (0, 0))).astype(jnp.bfloat16)

    # im2col in the wrapper (input is tiny here).  K ordering is (kh, kw, c),
    # matching weight_hwio.reshape(KH*KW*Cin, Cout).
    cols = [xh[:, kh:kh + H, kw:kw + W, :]
            for kh in range(KH) for kw in range(KW)]
    patches = jnp.concatenate(cols, axis=-1)                  # (B_pad, H, W, K)
    patches = jnp.pad(patches, ((0, 0), (0, 0), (0, 0), (0, K_pad - K)))
    patches = patches.reshape(B_pad * H * W, K_pad)           # lane-dense LHS

    w_mat = weight_hwio.reshape(K, Cout).astype(jnp.bfloat16)
    w_mat = jnp.pad(w_mat, ((0, K_pad - K), (0, Cout_p - Cout)))
    b_mat = jnp.pad(bias, (0, Cout_p - Cout)).reshape(1, Cout_p).astype(jnp.float32)

    M_blk = TB * H * W

    out = pl.pallas_call(
        _matmul_bias_relu_kernel,
        out_shape=jax.ShapeDtypeStruct((B_pad * H * W, Cout_p), jnp.bfloat16),
        grid_spec=pltpu.PrefetchScalarGridSpec(
            num_scalar_prefetch=0,
            grid=(B_pad // TB,),
            in_specs=[
                pl.BlockSpec((M_blk, K_pad), lambda b: (b, 0)),
                pl.BlockSpec((K_pad, Cout_p), lambda b: (0, 0)),
                pl.BlockSpec((1, Cout_p), lambda b: (0, 0)),
            ],
            out_specs=pl.BlockSpec((M_blk, Cout_p), lambda b: (b, 0)),
        ),
        compiler_params=pltpu.CompilerParams(
            dimension_semantics=("parallel",)),
    )(patches, w_mat, b_mat)

    # (B_pad*H*W, Cout_p) -> (B_pad, H, W, Cout_p) is a free row-major reshape.
    out = out.reshape(B_pad, H, W, Cout_p)[:B, :, :, :Cout]
    return out


def from3d_forward(x_ncthw, weight_hwio, bias):
    """Pallas equivalent of From3D.forward: (N, C, T, h, w) -> (N, C_out, T, h, w)."""
    N, C, T, h, w = x_ncthw.shape
    # permute(0,2,1,3,4).view(-1, C, h, w), then NCHW -> NHWC for the kernel.
    xx = jnp.transpose(x_ncthw, (0, 2, 3, 4, 1)).reshape(N * T, h, w, C)
    m = conv2d_relu_pallas(xx, weight_hwio, bias)              # (N*T, h, w, Cout) bf16
    Cout = m.shape[-1]
    # view(N, T, Cout, h, w).permute(0, 2, 1, 3, 4)
    m = m.reshape(N, T, h, w, Cout)
    return jnp.transpose(m, (0, 4, 1, 2, 3))


def _reference_forward(x_ncthw, weight_hwio, bias):
    """Pure-JAX reference with the same bf16-in / f32-accumulate / bf16-out math."""
    N, C, T, h, w = x_ncthw.shape
    xx = jnp.transpose(x_ncthw, (0, 2, 3, 4, 1)).reshape(N * T, h, w, C)
    y = lax.conv_general_dilated(
        xx.astype(jnp.bfloat16), weight_hwio.astype(jnp.bfloat16),
        window_strides=(1, 1), padding="SAME",
        dimension_numbers=("NHWC", "HWIO", "NHWC"),
        preferred_element_type=jnp.float32)
    y = jnp.maximum(y + bias, 0.0).astype(jnp.bfloat16)
    Cout = y.shape[-1]
    y = y.reshape(N, T, h, w, Cout)
    return jnp.transpose(y, (0, 4, 1, 2, 3))


if __name__ == "__main__":
    # Video tensor (N, C, T, h, w) at small shapes consistent with the module.
    N, C, T, h, w = 2, 4, 8, 16, 16
    C_out = 32

    key = jax.random.PRNGKey(0)
    kx, kw_, kb = jax.random.split(key, 3)
    x = jax.random.normal(kx, (N, C, T, h, w), dtype=jnp.float32)
    weight = jax.random.normal(kw_, (KH, KW, C, C_out), dtype=jnp.float32) * 0.1
    bias = jax.random.normal(kb, (C_out,), dtype=jnp.float32) * 0.1

    out = jax.block_until_ready(from3d_forward(x, weight, bias))
    ref = jax.block_until_ready(_reference_forward(x, weight, bias))

    assert out.shape == (N, C_out, T, h, w), out.shape
    max_err = float(jnp.max(jnp.abs(out.astype(jnp.float32) - ref.astype(jnp.float32))))
    assert max_err < 2e-2, max_err
    print("KERNEL_OK")
</pallas_src>

<mosaic_0001>
module attributes {stable_mosaic.version = 11 : i64} {
  func.func @_matmul_bias_relu_kernel(%arg0: i32, %arg1: memref<2048x128xbf16, #tpu.memory_space<vmem>>, %arg2: memref<128x128xbf16, #tpu.memory_space<vmem>>, %arg3: memref<1x128xf32, #tpu.memory_space<vmem>>, %arg4: memref<2048x128xbf16, #tpu.memory_space<vmem>>) attributes {dimension_semantics = [#tpu.dimension_semantics<parallel>], iteration_bounds = array<i64: 2>, scalar_prefetch = 0 : i64, scratch_operands = 0 : i64, tpu.core_type = #tpu.core_type<tc>, window_params = [{transform_indices = @transform_0, window_bounds = array<i64: 2048, 128>}, {pipeline_mode = #tpu.pipeline_mode<synchronous>, transform_indices = @transform_1, window_bounds = array<i64: 128, 128>}, {pipeline_mode = #tpu.pipeline_mode<synchronous>, transform_indices = @transform_2, window_bounds = array<i64: 1, 128>}, {transform_indices = @transform_3, window_bounds = array<i64: 2048, 128>}]} {
    %c0 = arith.constant 0 : index
    %c0_0 = arith.constant 0 : index
    %0 = vector.load %arg1[%c0, %c0_0] : memref<2048x128xbf16, #tpu.memory_space<vmem>>, vector<2048x128xbf16>
    %c0_1 = arith.constant 0 : index
    %c0_2 = arith.constant 0 : index
    %1 = vector.load %arg2[%c0_1, %c0_2] : memref<128x128xbf16, #tpu.memory_space<vmem>>, vector<128x128xbf16>
    %cst = arith.constant dense<0.000000e+00> : vector<2048x128xf32>
    %2 = tpu.matmul %0, %1, %cst {dimension_numbers = #tpu.dot_dimension_numbers<[1], [0], [0], [1], [0, 0, 1, 1], [], []>} : vector<2048x128xbf16>, vector<128x128xbf16>, vector<2048x128xf32> -> vector<2048x128xf32>
    %c0_3 = arith.constant 0 : index
    %c0_4 = arith.constant 0 : index
    %3 = vector.load %arg3[%c0_3, %c0_4] : memref<1x128xf32, #tpu.memory_space<vmem>>, vector<1x128xf32>
    %4 = vector.broadcast %3 : vector<1x128xf32> to vector<2048x128xf32>
    %5 = arith.addf %2, %4 : vector<2048x128xf32>
    %cst_5 = arith.constant 0.000000e+00 : f32
    %6 = vector.broadcast %cst_5 : f32 to vector<2048x128xf32>
    %7 = arith.maximumf %5, %6 : vector<2048x128xf32>
    %8 = arith.truncf %7 : vector<2048x128xf32> to vector<2048x128xbf16>
    %c0_6 = arith.constant 0 : index
    %c0_7 = arith.constant 0 : index
    %9 = vector.load %arg4[%c0_6, %c0_7] : memref<2048x128xbf16, #tpu.memory_space<vmem>>, vector<2048x128xbf16>
    tpu.vector_store %arg4[%c0_6, %c0_7], %8 {strides = array<i32>} : memref<2048x128xbf16, #tpu.memory_space<vmem>>, vector<2048x128xbf16>,
    return
  }
  func.func @transform_0(%arg0: i32) -> (i32, i32) {
    %c0_i32 = arith.constant 0 : i32
    %c0_i32_0 = arith.constant 0 : i32
    return %arg0, %c0_i32 : i32, i32
  }
  func.func @transform_1(%arg0: i32) -> (i32, i32) {
    %c0_i32 = arith.constant 0 : i32
    %c0_i32_0 = arith.constant 0 : i32
    %c0_i32_1 = arith.constant 0 : i32
    return %c0_i32, %c0_i32_0 : i32, i32
  }
  func.func @transform_2(%arg0: i32) -> (i32, i32) {
    %c0_i32 = arith.constant 0 : i32
    %c0_i32_0 = arith.constant 0 : i32
    %c0_i32_1 = arith.constant 0 : i32
    return %c0_i32, %c0_i32_0 : i32, i32
  }
  func.func @transform_3(%arg0: i32) -> (i32, i32) {
    %c0_i32 = arith.constant 0 : i32
    %c0_i32_0 = arith.constant 0 : i32
    return %arg0, %c0_i32 : i32, i32
  }
}

</mosaic_0001>

<bundles_post_ra>
// kernel: tpu_custom_call.1
= control target key start
LH: loop header
LB: loop body
LE: loop exit
PB: predicated region body
PF: predicated region fallthrough
CT: control target
= control target key end

     0   :  { %8 = vsyncpa [#allocation3], 0  ;;  %s6905_s0 = inlined_call_operand.hbm [shape: bf16[4096,128], index: 0, kind: input, shape index: {}]   ;;  %s6906_s1 = inlined_call_operand.hbm [shape: bf16[128,128], index: 1, kind: input, shape index: {}]   ;;  %s6907_s2 = inlined_call_operand.vmem [shape: f32[1,128], index: 2, kind: input, shape index: {}]   ;;  %s6908_s3 = inlined_call_operand.hbm [shape: bf16[4096,128], index: 3, kind: output, shape index: {}]  }
   0x1   :  { %10 = vsyncpa [#allocation3 + $0x1], 0 }
   0x2   :  { %11 = vsyncpa [#allocation6], 0 }
   0x3   :  { %12 = vsyncpa [#allocation4], 0 }
   0x4   :  { %14 = vsyncpa [#allocation4 + $0x1], 0  ;;  %s6200_s12 = smov 0   ;;  %s6202_s13 = smov 0  }
   0x5   :  { %s6204_s14 = smov 0   ;;  %s6206_s15 = smov 0  }
   0x6 LB: > { %s6221_s16 = sadd.s32 4294967295, %s6171_s15   ;;  %s3992_s17 = sadd.s32 4294967294, %s6171_s15   ;;  %s6171_s15 = sphi %s6206_s15, %s6930_s15   ;;  %s6167_s14 = sphi %s6204_s14, %s6929_s14   ;;  %s6163_s13 = sphi %s6202_s13, %s6928_s13   ;;  %s6159_s12 = sphi %s6200_s12, %s6927_s12  }
   0x7   : > { %p40_p0 = scmp.ne.s32.totalorder %s6163_s13, %s6159_s12  ;;  %p6909_p1 = scmp.eq.s32.totalorder %s6221_s16, 0 }
   0x8   : > { %p112_p3 = scmp.eq.s32.totalorder %s3992_s17, 1  ;;  %p3993_p5 = scmp.ge.s32.totalorder %s6171_s15, 1 }
   0x9   : > { %p6230_p4 = por %p6909_p1, %p40_p0  ;;  %p119_p7 = scmp.lt.s32.totalorder %s6171_s15, 3 }
   0xa   : > { %p6235_p6 = por %p112_p3, %p40_p0  ;;  %s6173_s21 = smov [#allocation5]  }
   0xb   : > { %s6913_s18 = scalar_select %p6230_p4, 1, 0 }
   0xc   : > { %s6914_s19 = scalar_select %p6235_p6, 1, 0 }
   0xd   : > { %p6240_p8 = pnand %p3993_p5, %p119_p7  ;;  %s131_s22 = sshll.u32 %s6173_s21, 4  ;;  %s132_s22 = int_to_ptr.vmem [resolvable:$true] %s131_s22 }
   0xe   : > { %s6254_s24 = sadd.s32 1, %s6171_s15   ;;  %s27_s25 = sadd.s32 1, %s6167_s14 }
   0xf   : > { %s6915_s20 = scalar_select %p6240_p8, 1, 0 }
  0x10   : > { %p5858_p9 = pneg %p6240_p8  ;;  %s24_s26 = ssub.s32 %s6171_s15, %s6254_s24 }
  0x11   : > { %s6060_s27 = scalar_lea.vmem %s132_s22, 1024  ;;  %p6068_p5 = scmp.lt.s32.totalorder %s132_s22, %s132_s22 }
  0x12   : > { %p6249_p11 = pnand %p5858_p9, %p6909_p1  ;;  %p6061_p13 = scmp.ne.s32.totalorder %s132_s22, %s6060_s27 }
  0x13   : > { %p6069_p7 = scmp.lt.s32.totalorder %s6060_s27, %s6060_s27 }
  0x14   : > { %p6051_p12 = pneg %p6249_p11 }
  0x15   : > { %p6070_p10 = por %p6069_p7, %p6068_p5 }
  0x16   : > { %p6063_p0 = pnand %p6061_p13, %p6051_p12 }
  0x18   : > { %p6064_p3 = pneg %p6063_p0 }
  0x1a   : > { %p6071_p2 = pnand %p6070_p10, %p6064_p3 }
  0x1c   : > { %6074 = shalt.err (!%p6071_p2)
}
  0x1d   : > { %s6174_s28 = smov 64   ;;  %s6175_s29 = smov 4  }
  0x1e   : > { %5861 = dma.hbm_to_vmem [thread:$0]  (!%p6249_p11), %s6906_s1, 1024, %s132_s22, [#allocation6], %s6174_s28, %s6174_s28, %s6175_s29  }
  0x1f   : > { %p25_p2 = scmp.eq.s32.totalorder %s24_s26, 0  ;;  %p34_p9 = scmp.ne.s32.totalorder %s6167_s14, %s6163_s13 }
  0x20   : > { %p35_p10 = scmp.eq.s32.totalorder %s6171_s15, 0  ;;  %p5871_p12 = scmp.lt.s32.totalorder %s6171_s15, 2 }
  0x21   : > { %s6274_s5 = scalar_select %p25_p2, %s6167_s14, %s27_s25  }
  0x22   : > { %p36_p13 = por %p35_p10, %p34_p9  ;;  %p6917_p0 = scmp.eq.s32.totalorder %s6221_s16, 1 }
  0x23   : > { %s148_s7 = sand.u32 1, %s6167_s14   ;;  %s4401_s8 = sshll.u32 %s6171_s15, 14 }
  0x24   : > { %p6278_p3 = por %p6917_p0, %p34_p9  ;;  %s3996_s9 = sshll.u32 %s148_s7, 10 }
  0x25   : > { %s6287_s17 = scalar_lea.hbm %s6905_s0, %s4401_s8  ;;  %s152_s21 = scalar_lea.vmem [#allocation2], %s3996_s9 }
  0x26   : > { %s6918_s6 = scalar_select %p6278_p3, 1, 0 }
  0x27   : > { %s159_s22 = sshll.u32 %s152_s21, 4  ;;  %p6289_p11 = pnand %p5871_p12, %p36_p13  ;;  %s6293_s22 = int_to_ptr.vmem [resolvable:$true] %s159_s22 }
  0x28   : > { %s6295_s25 = scalar_lea.sflag [#allocation3], %s148_s7  ;;  %s6075_s26 = scalar_lea.hbm %s6287_s17, 16384 }
  0x29   : > { %p6076_p5 = scmp.ne.s32.totalorder %s6287_s17, %s6075_s26  ;;  %p6077_p7 = pneg %p6289_p11 }
  0x2a   : > { %s6080_s4 = scalar_lea.hbm %s6905_s0, 32768  ;;  %p6081_p10 = scmp.lt.s32.totalorder %s6287_s17, %s6905_s0 }
  0x2b   : > { %p6078_p2 = pnand %p6077_p7, %p6076_p5  ;;  %p6082_p12 = scmp.lt.s32.totalorder %s6080_s4, %s6075_s26 }
  0x2d   : > { %p6079_p9 = pneg %p6078_p2  ;;  %p6083_p13 = por %p6082_p12, %p6081_p10 }
  0x2f   : > { %p6084_p0 = pnand %p6083_p13, %p6079_p9 }
  0x31   : > { %6087 = shalt.err (!%p6084_p0)
}
  0x32   : > { %s6088_s7 = scalar_lea.vmem %s6293_s22, 16384  ;;  %s6176_s10 = smov [#allocation2]  }
  0x33   : > { %p6089_p1 = scmp.ne.s32.totalorder %s6293_s22, %s6088_s7  ;;  %s6093_s11 = sshll.u32 %s6176_s10, 4  ;;  %s6094_s11 = int_to_ptr.vmem [resolvable:$false] %s6093_s11 }
  0x34   : > { %s6095_s21 = scalar_lea.vmem %s6094_s11, 32768  ;;  %p6096_p2 = scmp.lt.s32.totalorder %s6293_s22, %s6094_s11 }
  0x35   : > { %p6091_p6 = pnand %p6089_p1, %p6077_p7  ;;  %p6097_p3 = scmp.lt.s32.totalorder %s6095_s21, %s6088_s7 }
  0x37   : > { %p6092_p5 = pneg %p6091_p6  ;;  %p6098_p4 = por %p6097_p3, %p6096_p2 }
  0x39   : > { %p6099_p8 = pnand %p6098_p4, %p6092_p5 }
  0x3b   : > { %6102 = shalt.err (!%p6099_p8)
}
  0x3c   : > { %5865 = dma.hbm_to_vmem [thread:$0]  (!%p6289_p11), %s6287_s17, 16384, %s6293_s22, %s6295_s25, %s6174_s28, %s6174_s28, %s6175_s29  }
  0x3d   : > { %p6920_p1 = scmp.ne.s32.totalorder %s6915_s20, 0 }
  0x3e   : > { %s6322_s26 = sand.u32 (!%p6920_p1), 1, %s6163_s13   ;;  %p6921_p4 = scmp.ne.s32.totalorder (!%p6920_p1), %s6913_s18, 0 }
  0x3f   : > { %171 = sbr.rel (%p6920_p1) target bundleno = 572 (0x23c), region = 32  ;;  %s4000_s27 = sshll.u32 (!%p6920_p1), %s6322_s26, 10 }
  0x40   : > { %s174_s30 = scalar_lea.sflag (!%p6920_p1), [#allocation3], %s6322_s26  ;;  %s6328_s23 = scalar_lea.vmem (!%p6920_p1), [#allocation2], %s4000_s27 }
  0x44   : > { %6146 = dma.done.wait (%p6921_p4), %s174_s30, 16384  }
  0x45   : > { %6148 = vsyncadd (%p6921_p4), %s174_s30, 4294950912  ;;  %p6922_p6 = scmp.eq.s32.totalorder %s6221_s16, 0 }
  0x47   : > { %6150 = dma.done.wait (%p6922_p6), [#allocation6], 1024   ;;  %p6923_p8 = pmov %p6922_p6 }
  0x48   : > { %v5911_v0 = vld [vmem:[#allocation5 + $0x38] sm:$0xff]   ;;  %v5912_v1 = vld [vmem:[#allocation5 + $0x30] sm:$0xff]   ;;  %v5913_v2 = vld [vmem:[#allocation5 + $0x28] sm:$0xff]   ;;  %s6461_s28 = scalar_lea.vmem [#allocation7], %s4000_s27  ;;  %s4658_s4 = sshll.u32 %s6221_s16, 14 }
  0x49   : > { %6152 = vsyncadd (%p6923_p8), [#allocation6], 4294966272  ;;  %5562 = vmatprep.subr.bf16.mxu0 %v5911_v0  ;;  %5834 = vmatprep.subr.bf16.mxu1 %v5911_v0  ;;  %v5914_v3 = vld [vmem:[#allocation5 + $0x20] sm:$0xff]   ;;  %v5915_v6 = vld [vmem:[#allocation5 + $0x18] sm:$0xff]   ;;  %s3909_s8 = sshll.u32 %s6461_s28, 4  ;;  %s6856_s10 = scalar_lea.hbm %s6908_s3, %s4658_s4  ;;  %s6858_s8 = int_to_ptr.vmem [resolvable:$true] %s3909_s8 }
  0x4a   : > { %5563 = vmatpush3.bf16.msra.mxu0 %v5911_v0  ;;  %5842 = vmatpush3.bf16.msra.mxu1 %v5911_v0  ;;  %v5919_v4 = vld [vmem:[%s6328_s23] sm:$0xff]   ;;  %v5916_v7 = vld [vmem:[#allocation5 + $0x10] sm:$0xff]   ;;  %v5917_v8 = vld [vmem:[#allocation5 + $0x8] sm:$0xff]   ;;  %s3896_s16 = scalar_lea.sflag [#allocation4], %s6322_s26  ;;  %s6103_s11 = scalar_lea.vmem %s6858_s8, 16384 }
  0x4b   : > { %5564 = vmatprep.subr.bf16.mxu0 %v5912_v1  ;;  %5835 = vmatprep.subr.bf16.mxu1 %v5912_v1  ;;  %v5920_v5 = vld [vmem:[%s6328_s23 + $0x200] sm:$0xff]   ;;  %v5921_v10 = vld [vmem:[%s6328_s23 + $0x8] sm:$0xff]   ;;  %v5923_v12 = vld [vmem:[%s6328_s23 + $0x10] sm:$0xff]   ;;  %p6104_p3 = scmp.ne.s32.totalorder %s6858_s8, %s6103_s11  ;;  %p6924_p11 = scmp.ne.s32.totalorder %s6918_s6, 0 }
  0x4c   : > { %5578 = vmatprep.mubr.bf16.mxu0 %v5919_v4  ;;  %5706 = vmatprep.mubr.bf16.mxu1 %v5920_v5  ;;  %v5918_v9 = vld [vmem:[#allocation5] sm:$0xff]   ;;  %v5922_v11 = vld [vmem:[%s6328_s23 + $0x208] sm:$0xff]   ;;  %v5924_v13 = vld [vmem:[%s6328_s23 + $0x210] sm:$0xff]   ;;  %s6177_s21 = smov [#allocation7]  }
  0x4d   : > { %v5925_v14 = vld [vmem:[%s6328_s23 + $0x18] sm:$0xff]   ;;  %v5927_v16 = vld [vmem:[%s6328_s23 + $0x20] sm:$0xff]   ;;  %v5929_v18 = vld [vmem:[%s6328_s23 + $0x28] sm:$0xff]   ;;  %p6105_p7 = pnand %p6104_p3, %p6924_p11  ;;  %s6107_s27 = sshll.u32 %s6177_s21, 4  ;;  %s6108_s27 = int_to_ptr.vmem [resolvable:$false] %s6107_s27 }
  0x4e   : > { %5565 = vmatpush3.bf16.msra.mxu0 %v5912_v1  ;;  %5843 = vmatpush3.bf16.msra.mxu1 %v5912_v1  ;;  %v5926_v15 = vld [vmem:[%s6328_s23 + $0x218] sm:$0xff]   ;;  %v5928_v17 = vld [vmem:[%s6328_s23 + $0x220] sm:$0xff]   ;;  %v5930_v19 = vld [vmem:[%s6328_s23 + $0x228] sm:$0xff]   ;;  %s6109_s30 = scalar_lea.vmem %s6108_s27, 32768  ;;  %p6110_p10 = scmp.lt.s32.totalorder %s6858_s8, %s6108_s27 }
  0x4f   : > { %5566 = vmatprep.subr.bf16.mxu0 %v5913_v2  ;;  %5836 = vmatprep.subr.bf16.mxu1 %v5913_v2  ;;  %v5931_v20 = vld [vmem:[%s6328_s23 + $0x30] sm:$0xff]   ;;  %v5933_v22 = vld [vmem:[%s6328_s23 + $0x38] sm:$0xff]   ;;  %v5935_v24 = vld [vmem:[%s6328_s23 + $0x40] sm:$0xff]   ;;  %p6106_p9 = pneg %p6105_p7  ;;  %p6111_p12 = scmp.lt.s32.totalorder %s6109_s30, %s6103_s11 }
  0x50   : > { %v5932_v21 = vld [vmem:[%s6328_s23 + $0x230] sm:$0xff]   ;;  %v5934_v23 = vld [vmem:[%s6328_s23 + $0x238] sm:$0xff]   ;;  %v5936_v25 = vld [vmem:[%s6328_s23 + $0x240] sm:$0xff]  }
  0x51   : > { %v5937_v26 = vld [vmem:[%s6328_s23 + $0x48] sm:$0xff]   ;;  %v5939_v28 = vld [vmem:[%s6328_s23 + $0x50] sm:$0xff]   ;;  %v5941_v30 = vld [vmem:[%s6328_s23 + $0x58] sm:$0xff]   ;;  %p6112_p13 = por %p6111_p12, %p6110_p10 }
  0x52   : > { %5567 = vmatpush3.bf16.msra.mxu0 %v5913_v2  ;;  %5844 = vmatpush3.bf16.msra.mxu1 %v5913_v2  ;;  %v5938_v27 = vld [vmem:[%s6328_s23 + $0x248] sm:$0xff]   ;;  %v5940_v29 = vld [vmem:[%s6328_s23 + $0x250] sm:$0xff]   ;;  %v5942_v31 = vld [vmem:[%s6328_s23 + $0x258] sm:$0xff]  }
  0x53   : > { %5568 = vmatprep.subr.bf16.mxu0 %v5914_v3  ;;  %5837 = vmatprep.subr.bf16.mxu1 %v5914_v3  ;;  %v5943_v32 = vld [vmem:[%s6328_s23 + $0x60] sm:$0xff]   ;;  %v5945_v34 = vld [vmem:[%s6328_s23 + $0x68] sm:$0xff]   ;;  %v5947_v36 = vld [vmem:[%s6328_s23 + $0x70] sm:$0xff]   ;;  %p6113_p0 = pnand %p6112_p13, %p6106_p9 }
  0x54   : > { %v5944_v33 = vld [vmem:[%s6328_s23 + $0x260] sm:$0xff]   ;;  %v5946_v35 = vld [vmem:[%s6328_s23 + $0x268] sm:$0xff]   ;;  %v5948_v37 = vld [vmem:[%s6328_s23 + $0x270] sm:$0xff]  }
  0x55   : > { %v5949_v38 = vld [vmem:[%s6328_s23 + $0x78] sm:$0xff]   ;;  %v5951_v40 = vld [vmem:[%s6328_s23 + $0x80] sm:$0xff]   ;;  %v5953_v42 = vld [vmem:[%s6328_s23 + $0x88] sm:$0xff]  }
  0x56   : > { %5569 = vmatpush3.bf16.msra.mxu0 %v5914_v3  ;;  %5845 = vmatpush3.bf16.msra.mxu1 %v5914_v3  ;;  %v5950_v39 = vld [vmem:[%s6328_s23 + $0x278] sm:$0xff]   ;;  %v5952_v41 = vld [vmem:[%s6328_s23 + $0x280] sm:$0xff]   ;;  %v5954_v43 = vld [vmem:[%s6328_s23 + $0x288] sm:$0xff]  }
  0x57   : > { %5570 = vmatprep.subr.bf16.mxu0 %v5915_v6  ;;  %5838 = vmatprep.subr.bf16.mxu1 %v5915_v6  ;;  %v5955_v44 = vld [vmem:[%s6328_s23 + $0x90] sm:$0xff]   ;;  %v5957_v46 = vld [vmem:[%s6328_s23 + $0x98] sm:$0xff]   ;;  %v5959_v48 = vld [vmem:[%s6328_s23 + $0xa0] sm:$0xff]  }
  0x58   : > { %v5956_v45 = vld [vmem:[%s6328_s23 + $0x290] sm:$0xff]   ;;  %v5958_v47 = vld [vmem:[%s6328_s23 + $0x298] sm:$0xff]   ;;  %v5960_v49 = vld [vmem:[%s6328_s23 + $0x2a0] sm:$0xff]  }
  0x59   : > { %v5961_v50 = vld [vmem:[%s6328_s23 + $0xa8] sm:$0xff]   ;;  %v5963_v52 = vld [vmem:[%s6328_s23 + $0xb0] sm:$0xff]   ;;  %v5965_v54 = vld [vmem:[%s6328_s23 + $0xb8] sm:$0xff]  }
  0x5a   : > { %5571 = vmatpush3.bf16.msra.mxu0 %v5915_v6  ;;  %5846 = vmatpush3.bf16.msra.mxu1 %v5915_v6  ;;  %v5962_v51 = vld [vmem:[%s6328_s23 + $0x2a8] sm:$0xff]   ;;  %v5964_v53 = vld [vmem:[%s6328_s23 + $0x2b0] sm:$0xff]   ;;  %v5966_v55 = vld [vmem:[%s6328_s23 + $0x2b8] sm:$0xff]  }
  0x5b   : > { %5572 = vmatprep.subr.bf16.mxu0 %v5916_v7  ;;  %5839 = vmatprep.subr.bf16.mxu1 %v5916_v7  ;;  %v5967_v56 = vld [vmem:[%s6328_s23 + $0xc0] sm:$0xff]   ;;  %v5969_v58 = vld [vmem:[%s6328_s23 + $0xc8] sm:$0xff]   ;;  %v5971_v60 = vld [vmem:[%s6328_s23 + $0xd0] sm:$0xff]  }
  0x5c   : > { %v5968_v57 = vld [vmem:[%s6328_s23 + $0x2c0] sm:$0xff]   ;;  %v5970_v59 = vld [vmem:[%s6328_s23 + $0x2c8] sm:$0xff]   ;;  %v5972_v61 = vld [vmem:[%s6328_s23 + $0x2d0] sm:$0xff]  }
  0x5d   : > { %v5973_v62 = vld [vmem:[%s6328_s23 + $0xd8] sm:$0xff]   ;;  %v5975_v0 = vld [vmem:[%s6328_s23 + $0xe0] sm:$0xff]   ;;  %v5977_v2 = vld [vmem:[%s6328_s23 + $0xe8] sm:$0xff]  }
  0x5e   : > { %5573 = vmatpush3.bf16.msra.mxu0 %v5916_v7  ;;  %5847 = vmatpush3.bf16.msra.mxu1 %v5916_v7  ;;  %v5974_v63 = vld [vmem:[%s6328_s23 + $0x2d8] sm:$0xff]   ;;  %v5976_v1 = vld [vmem:[%s6328_s23 + $0x2e0] sm:$0xff]   ;;  %v5978_v3 = vld [vmem:[%s6328_s23 + $0x2e8] sm:$0xff]  }
  0x5f   : > { %5574 = vmatprep.subr.bf16.mxu0 %v5917_v8  ;;  %5840 = vmatprep.subr.bf16.mxu1 %v5917_v8  ;;  %v5979_v4 = vld [vmem:[%s6328_s23 + $0xf0] sm:$0xff]   ;;  %v5981_v6 = vld [vmem:[%s6328_s23 + $0xf8] sm:$0xff]  }
  0x60   : > { %v5980_v5 = vld [vmem:[%s6328_s23 + $0x2f0] sm:$0xff]   ;;  %v5982_v7 = vld [vmem:[%s6328_s23 + $0x2f8] sm:$0xff]  }
  0x62   : > { %5575 = vmatpush3.bf16.msra.mxu0 %v5917_v8  ;;  %5848 = vmatpush3.bf16.msra.mxu1 %v5917_v8  ;;  %v5983_v8 = vld [vmem:[%s6328_s23 + $0x100] sm:$0xff]  }
  0x63   : > { %5576 = vmatprep.subr.bf16.mxu0 %v5918_v9  ;;  %5841 = vmatprep.subr.bf16.mxu1 %v5918_v9 }
  0x66   : > { %5577 = vmatpush3.bf16.msra.mxu0 %v5918_v9  ;;  %5849 = vmatpush3.bf16.msra.mxu1 %v5918_v9  ;;  %v5984_v9 = vld [vmem:[%s6328_s23 + $0x300] sm:$0xff]  }
  0x69   : > { %5579 = vmatmul.mubr.bf16.vlgmr.msra.gmra.mxu0 %v5921_v10  ;;  %5707 = vmatmul.mubr.bf16.vlgmr.msra.gmra.mxu1 %v5922_v11  ;;  %v5985_v10 = vld [vmem:[%s6328_s23 + $0x108] sm:$0xff]  }
  0x6a   : > { %5582 = vmatprep.mubr.bf16.mxu0 %v5923_v12  ;;  %5710 = vmatprep.mubr.bf16.mxu1 %v5924_v13  ;;  %v5986_v11 = vld [vmem:[%s6328_s23 + $0x308] sm:$0xff]   ;;  %v5987_v12 = vld [vmem:[%s6328_s23 + $0x110] sm:$0xff]  }
  0x6b   : > { %v5988_v13 = vld [vmem:[%s6328_s23 + $0x310] sm:$0xff]  }
  0x71   : > { %5583 = vmatmul.mubr.bf16.gmra.mxu0 %v5925_v14  ;;  %5711 = vmatmul.mubr.bf16.gmra.mxu1 %v5926_v15  ;;  %v5989_v14 = vld [vmem:[%s6328_s23 + $0x118] sm:$0xff]  }
  0x72   : > { %5586 = vmatprep.mubr.bf16.mxu0 %v5927_v16  ;;  %5714 = vmatprep.mubr.bf16.mxu1 %v5928_v17  ;;  %v5990_v15 = vld [vmem:[%s6328_s23 + $0x318] sm:$0xff]   ;;  %v5991_v16 = vld [vmem:[%s6328_s23 + $0x120] sm:$0xff]  }
  0x73   : > { %v5992_v17 = vld [vmem:[%s6328_s23 + $0x320] sm:$0xff]  }
  0x79   : > { %5587 = vmatmul.mubr.bf16.gmra.mxu0 %v5929_v18  ;;  %5715 = vmatmul.mubr.bf16.gmra.mxu1 %v5930_v19  ;;  %v5993_v18 = vld [vmem:[%s6328_s23 + $0x128] sm:$0xff]  }
  0x7a   : > { %5590 = vmatprep.mubr.bf16.mxu0 %v5931_v20  ;;  %5718 = vmatprep.mubr.bf16.mxu1 %v5932_v21  ;;  %v5994_v19 = vld [vmem:[%s6328_s23 + $0x328] sm:$0xff]   ;;  %v5995_v20 = vld [vmem:[%s6328_s23 + $0x130] sm:$0xff]  }
  0x7b   : > { %v5996_v21 = vld [vmem:[%s6328_s23 + $0x330] sm:$0xff]  }
  0x81   : > { %5591 = vmatmul.mubr.bf16.gmra.mxu0 %v5933_v22  ;;  %5719 = vmatmul.mubr.bf16.gmra.mxu1 %v5934_v23  ;;  %v5997_v22 = vld [vmem:[%s6328_s23 + $0x138] sm:$0xff]  }
  0x82   : > { %5594 = vmatprep.mubr.bf16.mxu0 %v5935_v24  ;;  %5722 = vmatprep.mubr.bf16.mxu1 %v5936_v25  ;;  %v5998_v23 = vld [vmem:[%s6328_s23 + $0x338] sm:$0xff]   ;;  %v5999_v24 = vld [vmem:[%s6328_s23 + $0x140] sm:$0xff]  }
  0x83   : > { %v6000_v25 = vld [vmem:[%s6328_s23 + $0x340] sm:$0xff]  }
  0x89   : > { %5595 = vmatmul.mubr.bf16.gmra.mxu0 %v5937_v26  ;;  %5723 = vmatmul.mubr.bf16.gmra.mxu1 %v5938_v27  ;;  %v6001_v26 = vld [vmem:[%s6328_s23 + $0x148] sm:$0xff]  }
  0x8a   : > { %5598 = vmatprep.mubr.bf16.mxu0 %v5939_v28  ;;  %5726 = vmatprep.mubr.bf16.mxu1 %v5940_v29  ;;  %v6002_v27 = vld [vmem:[%s6328_s23 + $0x348] sm:$0xff]   ;;  %v6003_v28 = vld [vmem:[%s6328_s23 + $0x150] sm:$0xff]  }
  0x8b   : > { %v6004_v29 = vld [vmem:[%s6328_s23 + $0x350] sm:$0xff]  }
  0x91   : > { %5599 = vmatmul.mubr.bf16.gmra.mxu0 %v5941_v30  ;;  %5727 = vmatmul.mubr.bf16.gmra.mxu1 %v5942_v31  ;;  %v6005_v30 = vld [vmem:[%s6328_s23 + $0x158] sm:$0xff]  }
  0x92   : > { %5602 = vmatprep.mubr.bf16.mxu0 %v5943_v32  ;;  %5730 = vmatprep.mubr.bf16.mxu1 %v5944_v33  ;;  %v6006_v31 = vld [vmem:[%s6328_s23 + $0x358] sm:$0xff]   ;;  %v6007_v32 = vld [vmem:[%s6328_s23 + $0x160] sm:$0xff]  }
  0x93   : > { %v6008_v33 = vld [vmem:[%s6328_s23 + $0x360] sm:$0xff]  }
  0x99   : > { %5603 = vmatmul.mubr.bf16.gmra.mxu0 %v5945_v34  ;;  %5731 = vmatmul.mubr.bf16.gmra.mxu1 %v5946_v35  ;;  %v6009_v34 = vld [vmem:[%s6328_s23 + $0x168] sm:$0xff]  }
  0x9a   : > { %5606 = vmatprep.mubr.bf16.mxu0 %v5947_v36  ;;  %5734 = vmatprep.mubr.bf16.mxu1 %v5948_v37  ;;  %v6010_v35 = vld [vmem:[%s6328_s23 + $0x368] sm:$0xff]   ;;  %v6011_v36 = vld [vmem:[%s6328_s23 + $0x170] sm:$0xff]  }
  0x9b   : > { %v6012_v37 = vld [vmem:[%s6328_s23 + $0x370] sm:$0xff]  }
  0xa1   : > { %5607 = vmatmul.mubr.bf16.gmra.mxu0 %v5949_v38  ;;  %5735 = vmatmul.mubr.bf16.gmra.mxu1 %v5950_v39  ;;  %v6013_v38 = vld [vmem:[%s6328_s23 + $0x178] sm:$0xff]  }
  0xa2   : > { %5610 = vmatprep.mubr.bf16.mxu0 %v5951_v40  ;;  %5738 = vmatprep.mubr.bf16.mxu1 %v5952_v41  ;;  %v6014_v39 = vld [vmem:[%s6328_s23 + $0x378] sm:$0xff]   ;;  %v6015_v40 = vld [vmem:[%s6328_s23 + $0x180] sm:$0xff]  }
  0xa3   : > { %v6016_v41 = vld [vmem:[%s6328_s23 + $0x380] sm:$0xff]  }
  0xa9   : > { %5611 = vmatmul.mubr.bf16.gmra.mxu0 %v5953_v42  ;;  %5739 = vmatmul.mubr.bf16.gmra.mxu1 %v5954_v43  ;;  %v6017_v42 = vld [vmem:[%s6328_s23 + $0x188] sm:$0xff]  }
  0xaa   : > { %5614 = vmatprep.mubr.bf16.mxu0 %v5955_v44  ;;  %5742 = vmatprep.mubr.bf16.mxu1 %v5956_v45  ;;  %v6018_v43 = vld [vmem:[%s6328_s23 + $0x388] sm:$0xff]   ;;  %v6019_v44 = vld [vmem:[%s6328_s23 + $0x190] sm:$0xff]  }
  0xab   : > { %v6020_v45 = vld [vmem:[%s6328_s23 + $0x390] sm:$0xff]  }
  0xb1   : > { %5615 = vmatmul.mubr.bf16.gmra.mxu0 %v5957_v46  ;;  %5743 = vmatmul.mubr.bf16.gmra.mxu1 %v5958_v47  ;;  %v6443_v46 = vld [vmem:[%s6907_s2] ss:$0 sm:$0xff] }
  0xb2   : > { %5618 = vmatprep.mubr.bf16.mxu0 %v5959_v48  ;;  %5746 = vmatprep.mubr.bf16.mxu1 %v5960_v49 }
  0xb9   : > { %5619 = vmatmul.mubr.bf16.gmra.mxu0 %v5961_v50  ;;  %5747 = vmatmul.mubr.bf16.gmra.mxu1 %v5962_v51 }
  0xba   : > { %5622 = vmatprep.mubr.bf16.mxu0 %v5963_v52  ;;  %5750 = vmatprep.mubr.bf16.mxu1 %v5964_v53 }
  0xc1   : > { %5623 = vmatmul.mubr.bf16.gmra.mxu0 %v5965_v54  ;;  %5751 = vmatmul.mubr.bf16.gmra.mxu1 %v5966_v55 }
  0xc2   : > { %5626 = vmatprep.mubr.bf16.mxu0 %v5967_v56  ;;  %5754 = vmatprep.mubr.bf16.mxu1 %v5968_v57  ;;  %v6021_v57 = vld [vmem:[%s6328_s23 + $0x198] sm:$0xff]  }
  0xc9   : > { %5627 = vmatmul.mubr.bf16.gmra.mxu0 %v5969_v58  ;;  %5755 = vmatmul.mubr.bf16.gmra.mxu1 %v5970_v59  ;;  %v6022_v58 = vld [vmem:[%s6328_s23 + $0x398] sm:$0xff]  }
  0xca   : > { %5630 = vmatprep.mubr.bf16.mxu0 %v5971_v60  ;;  %5758 = vmatprep.mubr.bf16.mxu1 %v5972_v61  ;;  %v6023_v61 = vld [vmem:[%s6328_s23 + $0x1a0] sm:$0xff]  }
  0xd1   : > { %5631 = vmatmul.mubr.bf16.gmra.mxu0 %v5973_v62  ;;  %5759 = vmatmul.mubr.bf16.gmra.mxu1 %v5974_v63  ;;  %v6024_v62 = vld [vmem:[%s6328_s23 + $0x3a0] sm:$0xff]  }
  0xd2   : > { %5634 = vmatprep.mubr.bf16.mxu0 %v5975_v0  ;;  %5762 = vmatprep.mubr.bf16.mxu1 %v5976_v1 }
  0xd9   : > { %5635 = vmatmul.mubr.bf16.gmra.mxu0 %v5977_v2  ;;  %5763 = vmatmul.mubr.bf16.gmra.mxu1 %v5978_v3 }
  0xda   : > { %5638 = vmatprep.mubr.bf16.mxu0 %v5979_v4  ;;  %5766 = vmatprep.mubr.bf16.mxu1 %v5980_v5 }
  0xe1   : > { %5639 = vmatmul.mubr.bf16.gmra.mxu0 %v5981_v6  ;;  %5767 = vmatmul.mubr.bf16.gmra.mxu1 %v5982_v7 }
  0xe2   : > { %5642 = vmatprep.mubr.bf16.mxu0 %v5983_v8  ;;  %5770 = vmatprep.mubr.bf16.mxu1 %v5984_v9 }
  0xe9   : > { %5643 = vmatmul.mubr.bf16.gmra.mxu0 %v5985_v10  ;;  %5771 = vmatmul.mubr.bf16.gmra.mxu1 %v5986_v11 }
  0xea   : > { %5646 = vmatprep.mubr.bf16.mxu0 %v5987_v12  ;;  %5774 = vmatprep.mubr.bf16.mxu1 %v5988_v13 }
  0xf1   : > { %5647 = vmatmul.mubr.bf16.gmra.mxu0 %v5989_v14  ;;  %5775 = vmatmul.mubr.bf16.gmra.mxu1 %v5990_v15 }
  0xf2   : > { %5650 = vmatprep.mubr.bf16.mxu0 %v5991_v16  ;;  %5778 = vmatprep.mubr.bf16.mxu1 %v5992_v17 }
  0xf9   : > { %5651 = vmatmul.mubr.bf16.gmra.mxu0 %v5993_v18  ;;  %5779 = vmatmul.mubr.bf16.gmra.mxu1 %v5994_v19 }
  0xfa   : > { %5654 = vmatprep.mubr.bf16.mxu0 %v5995_v20  ;;  %5782 = vmatprep.mubr.bf16.mxu1 %v5996_v21 }
 0x101   : > { %5655 = vmatmul.mubr.bf16.gmra.mxu0 %v5997_v22  ;;  %5783 = vmatmul.mubr.bf16.gmra.mxu1 %v5998_v23 }
 0x102   : > { %5658 = vmatprep.mubr.bf16.mxu0 %v5999_v24  ;;  %5786 = vmatprep.mubr.bf16.mxu1 %v6000_v25  ;;  %v6025_v25 = vld [vmem:[%s6328_s23 + $0x1a8] sm:$0xff]  }
 0x109   : > { %5659 = vmatmul.mubr.bf16.gmra.mxu0 %v6001_v26  ;;  %5787 = vmatmul.mubr.bf16.gmra.mxu1 %v6002_v27  ;;  %v6026_v26 = vld [vmem:[%s6328_s23 + $0x3a8] sm:$0xff]  }
 0x10a   : > { %5662 = vmatprep.mubr.bf16.mxu0 %v6003_v28  ;;  %5790 = vmatprep.mubr.bf16.mxu1 %v6004_v29  ;;  %v6027_v29 = vld [vmem:[%s6328_s23 + $0x1b0] sm:$0xff]  }
 0x111   : > { %5663 = vmatmul.mubr.bf16.gmra.mxu0 %v6005_v30  ;;  %5791 = vmatmul.mubr.bf16.gmra.mxu1 %v6006_v31  ;;  %v6028_v30 = vld [vmem:[%s6328_s23 + $0x3b0] sm:$0xff]  }
 0x112   : > { %5666 = vmatprep.mubr.bf16.mxu0 %v6007_v32  ;;  %5794 = vmatprep.mubr.bf16.mxu1 %v6008_v33 }
 0x119   : > { %5667 = vmatmul.mubr.bf16.gmra.mxu0 %v6009_v34  ;;  %5795 = vmatmul.mubr.bf16.gmra.mxu1 %v6010_v35 }
 0x11a   : > { %5670 = vmatprep.mubr.bf16.mxu0 %v6011_v36  ;;  %5798 = vmatprep.mubr.bf16.mxu1 %v6012_v37 }
 0x121   : > { %5671 = vmatmul.mubr.bf16.gmra.mxu0 %v6013_v38  ;;  %5799 = vmatmul.mubr.bf16.gmra.mxu1 %v6014_v39 }
 0x122   : > { %5674 = vmatprep.mubr.bf16.mxu0 %v6015_v40  ;;  %5802 = vmatprep.mubr.bf16.mxu1 %v6016_v41 }
 0x129   : > { %v5580_v47 = vpop.f32.mrf.mxu0  ;;  %5675 = vmatmul.mubr.bf16.gmra.mxu0 %v6017_v42  ;;  %v5708_v48 = vpop.f32.mrf.mxu1  ;;  %5803 = vmatmul.mubr.bf16.gmra.mxu1 %v6018_v43 }
 0x12a   : > { %5678 = vmatprep.mubr.bf16.mxu0 %v6019_v44  ;;  %5806 = vmatprep.mubr.bf16.mxu1 %v6020_v45  ;;  %v1345_v49 = vadd.f32 %v5580_v47, %v6443_v46  ;;  %v1857_v50 = vadd.f32 %v5708_v48, %v6443_v46 }
 0x12b   : > { %v1336_v51 = vpop.f32.mrf.mxu0  ;;  %v1848_v52 = vpop.f32.mrf.mxu1 }
 0x12c   : > { %v1337_v53 = vadd.f32 %v6443_v46, %v1336_v51  ;;  %v1849_v54 = vadd.f32 %v6443_v46, %v1848_v52  ;;  %v2361_v63 = vmax.f32 %v1345_v49, 0.0  ;;  %v2489_v0 = vmax.f32 %v1857_v50, 0.0 }
 0x12d   : > { %v5581_v55 = vpop.f32.mrf.mxu0  ;;  %v5709_v56 = vpop.f32.mrf.mxu1 }
 0x12e   : > { %v1348_v59 = vadd.f32 %v5581_v55, %v6443_v46  ;;  %v1860_v60 = vadd.f32 %v5709_v56, %v6443_v46  ;;  %v2359_v7 = vmax.f32 %v1337_v53, 0.0  ;;  %v2487_v8 = vmax.f32 %v1849_v54, 0.0 }
 0x12f   : > { %v1339_v1 = vpop.f32.mrf.mxu0  ;;  %v1851_v2 = vpop.f32.mrf.mxu1 }
 0x130   : > { %v2362_v3 = vmax.f32 %v1348_v59, 0.0  ;;  %v2490_v4 = vmax.f32 %v1860_v60, 0.0  ;;  %v1340_v5 = vadd.f32 %v6443_v46, %v1339_v1  ;;  %v1852_v6 = vadd.f32 %v6443_v46, %v1851_v2  ;;  %v6030_v59 = vld [vmem:[%s6328_s23 + $0x3b8] sm:$0xff]  }
 0x131   : > { %v5584_v9 = vpop.f32.mrf.mxu0  ;;  %5679 = vmatmul.mubr.bf16.gmra.mxu0 %v6021_v57  ;;  %v5712_v10 = vpop.f32.mrf.mxu1  ;;  %5807 = vmatmul.mubr.bf16.gmra.mxu1 %v6022_v58  ;;  %v6029_v58 = vld [vmem:[%s6328_s23 + $0x1b8] sm:$0xff]  }
 0x132   : > { %v4667_v11 = vpack.c.bf16 %v2362_v3, %v2361_v63  ;;  %v4987_v12 = vpack.c.bf16 %v2490_v4, %v2489_v0  ;;  %v2360_v13 = vmax.f32 %v1340_v5, 0.0  ;;  %v2488_v14 = vmax.f32 %v1852_v6, 0.0  ;;  %5682 = vmatprep.mubr.bf16.mxu0 %v6023_v61  ;;  %5810 = vmatprep.mubr.bf16.mxu1 %v6024_v62  ;;  %v6031_v62 = vld [vmem:[%s6328_s23 + $0x1c0] sm:$0xff]  }
 0x133   : > { %v1361_v15 = vadd.f32 %v5584_v9, %v6443_v46  ;;  %v1873_v16 = vadd.f32 %v5712_v10, %v6443_v46  ;;  %v1352_v17 = vpop.f32.mrf.mxu0  ;;  %v1864_v18 = vpop.f32.mrf.mxu1  ;;  %v6032_v63 = vld [vmem:[%s6328_s23 + $0x3c0] sm:$0xff]  }
 0x134   : > { %5299 = vst [vmem:[%s6461_s28 + $0x8] sm:$0xff] %v4667_v11   ;;  %5363 = vst [vmem:[%s6461_s28 + $0x208] sm:$0xff] %v4987_v12   ;;  %v4662_v19 = vpack.c.bf16 %v2360_v13, %v2359_v7  ;;  %v4982_v20 = vpack.c.bf16 %v2488_v14, %v2487_v8  ;;  %v1353_v21 = vadd.f32 %v6443_v46, %v1352_v17 }
 0x135   : > { %v1865_v22 = vadd.f32 %v6443_v46, %v1864_v18  ;;  %v5585_v23 = vpop.f32.mrf.mxu0  ;;  %v5713_v24 = vpop.f32.mrf.mxu1  ;;  %v2365_v31 = vmax.f32 %v1361_v15, 0.0  ;;  %v2493_v32 = vmax.f32 %v1873_v16, 0.0 }
 0x136   : > { %4663 = vst [vmem:[%s6461_s28] sm:$0xff] %v4662_v19   ;;  %5362 = vst [vmem:[%s6461_s28 + $0x200] sm:$0xff] %v4982_v20   ;;  %v1364_v27 = vadd.f32 %v5585_v23, %v6443_v46  ;;  %v1876_v28 = vadd.f32 %v5713_v24, %v6443_v46  ;;  %v2363_v39 = vmax.f32 %v1353_v21, 0.0 }
 0x137   : > { %v1355_v33 = vpop.f32.mrf.mxu0  ;;  %v1867_v34 = vpop.f32.mrf.mxu1  ;;  %v2491_v40 = vmax.f32 %v1865_v22, 0.0 }
 0x138   : > { %v2366_v35 = vmax.f32 %v1364_v27, 0.0  ;;  %v2494_v36 = vmax.f32 %v1876_v28, 0.0  ;;  %v1356_v37 = vadd.f32 %v6443_v46, %v1355_v33  ;;  %v1868_v38 = vadd.f32 %v6443_v46, %v1867_v34  ;;  %v6034_v27 = vld [vmem:[%s6328_s23 + $0x3c8] sm:$0xff]  }
 0x139   : > { %v5588_v41 = vpop.f32.mrf.mxu0  ;;  %5683 = vmatmul.mubr.bf16.gmra.mxu0 %v6025_v25  ;;  %v5716_v42 = vpop.f32.mrf.mxu1  ;;  %5811 = vmatmul.mubr.bf16.gmra.mxu1 %v6026_v26  ;;  %v6033_v26 = vld [vmem:[%s6328_s23 + $0x1c8] sm:$0xff]  }
 0x13a   : > { %v4677_v43 = vpack.c.bf16 %v2366_v35, %v2365_v31  ;;  %v4997_v44 = vpack.c.bf16 %v2494_v36, %v2493_v32  ;;  %v2364_v45 = vmax.f32 %v1356_v37, 0.0  ;;  %v2492_v47 = vmax.f32 %v1868_v38, 0.0  ;;  %5686 = vmatprep.mubr.bf16.mxu0 %v6027_v29  ;;  %5814 = vmatprep.mubr.bf16.mxu1 %v6028_v30  ;;  %v6035_v30 = vld [vmem:[%s6328_s23 + $0x1d0] sm:$0xff]  }
 0x13b   : > { %v1377_v48 = vadd.f32 %v5588_v41, %v6443_v46  ;;  %v1889_v49 = vadd.f32 %v5716_v42, %v6443_v46  ;;  %v1368_v50 = vpop.f32.mrf.mxu0  ;;  %v1880_v51 = vpop.f32.mrf.mxu1  ;;  %v6036_v31 = vld [vmem:[%s6328_s23 + $0x3d0] sm:$0xff]  }
 0x13c   : > { %5301 = vst [vmem:[%s6461_s28 + $0x18] sm:$0xff] %v4677_v43   ;;  %5365 = vst [vmem:[%s6461_s28 + $0x218] sm:$0xff] %v4997_v44   ;;  %v4672_v52 = vpack.c.bf16 %v2364_v45, %v2363_v39  ;;  %v4992_v53 = vpack.c.bf16 %v2492_v47, %v2491_v40  ;;  %v1369_v54 = vadd.f32 %v6443_v46, %v1368_v50 }
 0x13d   : > { %v1881_v55 = vadd.f32 %v6443_v46, %v1880_v51  ;;  %v5589_v56 = vpop.f32.mrf.mxu0  ;;  %v5717_v57 = vpop.f32.mrf.mxu1  ;;  %v2369_v0 = vmax.f32 %v1377_v48, 0.0  ;;  %v2497_v1 = vmax.f32 %v1889_v49, 0.0 }
 0x13e   : > { %5300 = vst [vmem:[%s6461_s28 + $0x10] sm:$0xff] %v4672_v52   ;;  %5364 = vst [vmem:[%s6461_s28 + $0x210] sm:$0xff] %v4992_v53   ;;  %v1380_v60 = vadd.f32 %v5589_v56, %v6443_v46  ;;  %v1892_v61 = vadd.f32 %v5717_v57, %v6443_v46  ;;  %v2367_v8 = vmax.f32 %v1369_v54, 0.0 }
 0x13f   : > { %v1371_v2 = vpop.f32.mrf.mxu0  ;;  %v1883_v3 = vpop.f32.mrf.mxu1  ;;  %v2495_v9 = vmax.f32 %v1881_v55, 0.0 }
 0x140   : > { %v2370_v4 = vmax.f32 %v1380_v60, 0.0  ;;  %v2498_v5 = vmax.f32 %v1892_v61, 0.0  ;;  %v1372_v6 = vadd.f32 %v6443_v46, %v1371_v2  ;;  %v1884_v7 = vadd.f32 %v6443_v46, %v1883_v3  ;;  %v6038_v60 = vld [vmem:[%s6328_s23 + $0x3d8] sm:$0xff]  }
 0x141   : > { %v5592_v10 = vpop.f32.mrf.mxu0  ;;  %5687 = vmatmul.mubr.bf16.gmra.mxu0 %v6029_v58  ;;  %v5720_v11 = vpop.f32.mrf.mxu1  ;;  %5815 = vmatmul.mubr.bf16.gmra.mxu1 %v6030_v59  ;;  %v6037_v59 = vld [vmem:[%s6328_s23 + $0x1d8] sm:$0xff]  }
 0x142   : > { %v4687_v12 = vpack.c.bf16 %v2370_v4, %v2369_v0  ;;  %v5007_v13 = vpack.c.bf16 %v2498_v5, %v2497_v1  ;;  %v2368_v14 = vmax.f32 %v1372_v6, 0.0  ;;  %v2496_v15 = vmax.f32 %v1884_v7, 0.0  ;;  %5690 = vmatprep.mubr.bf16.mxu0 %v6031_v62  ;;  %5818 = vmatprep.mubr.bf16.mxu1 %v6032_v63  ;;  %v6039_v63 = vld [vmem:[%s6328_s23 + $0x1e0] sm:$0xff]  }
 0x143   : > { %v1393_v16 = vadd.f32 %v5592_v10, %v6443_v46  ;;  %v1905_v17 = vadd.f32 %v5720_v11, %v6443_v46  ;;  %v1384_v18 = vpop.f32.mrf.mxu0  ;;  %v1896_v19 = vpop.f32.mrf.mxu1  ;;  %v6040_v0 = vld [vmem:[%s6328_s23 + $0x3e0] sm:$0xff]  }
 0x144   : > { %5303 = vst [vmem:[%s6461_s28 + $0x28] sm:$0xff] %v4687_v12   ;;  %5367 = vst [vmem:[%s6461_s28 + $0x228] sm:$0xff] %v5007_v13   ;;  %v4682_v20 = vpack.c.bf16 %v2368_v14, %v2367_v8  ;;  %v5002_v21 = vpack.c.bf16 %v2496_v15, %v2495_v9  ;;  %v1385_v22 = vadd.f32 %v6443_v46, %v1384_v18 }
 0x145   : > { %v1897_v23 = vadd.f32 %v6443_v46, %v1896_v19  ;;  %v5593_v24 = vpop.f32.mrf.mxu0  ;;  %v5721_v25 = vpop.f32.mrf.mxu1  ;;  %v2373_v32 = vmax.f32 %v1393_v16, 0.0  ;;  %v2501_v33 = vmax.f32 %v1905_v17, 0.0 }
 0x146   : > { %5302 = vst [vmem:[%s6461_s28 + $0x20] sm:$0xff] %v4682_v20   ;;  %5366 = vst [vmem:[%s6461_s28 + $0x220] sm:$0xff] %v5002_v21   ;;  %v1396_v28 = vadd.f32 %v5593_v24, %v6443_v46  ;;  %v1908_v29 = vadd.f32 %v5721_v25, %v6443_v46  ;;  %v2371_v40 = vmax.f32 %v1385_v22, 0.0 }
 0x147   : > { %v1387_v34 = vpop.f32.mrf.mxu0  ;;  %v1899_v35 = vpop.f32.mrf.mxu1  ;;  %v2499_v41 = vmax.f32 %v1897_v23, 0.0 }
 0x148   : > { %v2374_v36 = vmax.f32 %v1396_v28, 0.0  ;;  %v2502_v37 = vmax.f32 %v1908_v29, 0.0  ;;  %v1388_v38 = vadd.f32 %v6443_v46, %v1387_v34  ;;  %v1900_v39 = vadd.f32 %v6443_v46, %v1899_v35  ;;  %v6042_v28 = vld [vmem:[%s6328_s23 + $0x3e8] sm:$0xff]  }
 0x149   : > { %v5596_v42 = vpop.f32.mrf.mxu0  ;;  %5691 = vmatmul.mubr.bf16.gmra.mxu0 %v6033_v26  ;;  %v5724_v43 = vpop.f32.mrf.mxu1  ;;  %5819 = vmatmul.mubr.bf16.gmra.mxu1 %v6034_v27  ;;  %v6041_v27 = vld [vmem:[%s6328_s23 + $0x1e8] sm:$0xff]  }
 0x14a   : > { %v4697_v44 = vpack.c.bf16 %v2374_v36, %v2373_v32  ;;  %v5017_v45 = vpack.c.bf16 %v2502_v37, %v2501_v33  ;;  %v2372_v47 = vmax.f32 %v1388_v38, 0.0  ;;  %v2500_v48 = vmax.f32 %v1900_v39, 0.0  ;;  %5694 = vmatprep.mubr.bf16.mxu0 %v6035_v30  ;;  %5822 = vmatprep.mubr.bf16.mxu1 %v6036_v31  ;;  %v6043_v31 = vld [vmem:[%s6328_s23 + $0x1f0] sm:$0xff]  }
 0x14b   : > { %v1409_v49 = vadd.f32 %v5596_v42, %v6443_v46  ;;  %v1921_v50 = vadd.f32 %v5724_v43, %v6443_v46  ;;  %v1400_v51 = vpop.f32.mrf.mxu0  ;;  %v1912_v52 = vpop.f32.mrf.mxu1  ;;  %v6044_v32 = vld [vmem:[%s6328_s23 + $0x3f0] sm:$0xff]  }
 0x14c   : > { %5305 = vst [vmem:[%s6461_s28 + $0x38] sm:$0xff] %v4697_v44   ;;  %5369 = vst [vmem:[%s6461_s28 + $0x238] sm:$0xff] %v5017_v45   ;;  %v4692_v53 = vpack.c.bf16 %v2372_v47, %v2371_v40  ;;  %v5012_v54 = vpack.c.bf16 %v2500_v48, %v2499_v41  ;;  %v1401_v55 = vadd.f32 %v6443_v46, %v1400_v51 }
 0x14d   : > { %v1913_v56 = vadd.f32 %v6443_v46, %v1912_v52  ;;  %v5597_v57 = vpop.f32.mrf.mxu0  ;;  %v5725_v58 = vpop.f32.mrf.mxu1  ;;  %v2377_v1 = vmax.f32 %v1409_v49, 0.0  ;;  %v2505_v2 = vmax.f32 %v1921_v50, 0.0 }
 0x14e   : > { %5304 = vst [vmem:[%s6461_s28 + $0x30] sm:$0xff] %v4692_v53   ;;  %5368 = vst [vmem:[%s6461_s28 + $0x230] sm:$0xff] %v5012_v54   ;;  %v1412_v61 = vadd.f32 %v5597_v57, %v6443_v46  ;;  %v1924_v62 = vadd.f32 %v5725_v58, %v6443_v46  ;;  %v2375_v9 = vmax.f32 %v1401_v55, 0.0 }
 0x14f   : > { %v1403_v3 = vpop.f32.mrf.mxu0  ;;  %v1915_v4 = vpop.f32.mrf.mxu1  ;;  %v2503_v10 = vmax.f32 %v1913_v56, 0.0 }
 0x150   : > { %v2378_v5 = vmax.f32 %v1412_v61, 0.0  ;;  %v2506_v6 = vmax.f32 %v1924_v62, 0.0  ;;  %v1404_v7 = vadd.f32 %v6443_v46, %v1403_v3  ;;  %v1916_v8 = vadd.f32 %v6443_v46, %v1915_v4  ;;  %v6046_v61 = vld [vmem:[%s6328_s23 + $0x3f8] sm:$0xff]  }
 0x151   : > { %v5600_v11 = vpop.f32.mrf.mxu0  ;;  %5695 = vmatmul.mubr.bf16.gmra.mxu0 %v6037_v59  ;;  %v5728_v12 = vpop.f32.mrf.mxu1  ;;  %5823 = vmatmul.mubr.bf16.gmra.mxu1 %v6038_v60  ;;  %v6045_v60 = vld [vmem:[%s6328_s23 + $0x1f8] sm:$0xff]  }
 0x152   : > { %v4707_v13 = vpack.c.bf16 %v2378_v5, %v2377_v1  ;;  %v5027_v14 = vpack.c.bf16 %v2506_v6, %v2505_v2  ;;  %v2376_v15 = vmax.f32 %v1404_v7, 0.0  ;;  %v2504_v16 = vmax.f32 %v1916_v8, 0.0  ;;  %5698 = vmatprep.mubr.bf16.mxu0 %v6039_v63  ;;  %5826 = vmatprep.mubr.bf16.mxu1 %v6040_v0 }
 0x153   : > { %v1425_v17 = vadd.f32 %v5600_v11, %v6443_v46  ;;  %v1937_v18 = vadd.f32 %v5728_v12, %v6443_v46  ;;  %v1416_v19 = vpop.f32.mrf.mxu0  ;;  %v1928_v20 = vpop.f32.mrf.mxu1 }
 0x154   : > { %5307 = vst [vmem:[%s6461_s28 + $0x48] sm:$0xff] %v4707_v13   ;;  %5371 = vst [vmem:[%s6461_s28 + $0x248] sm:$0xff] %v5027_v14   ;;  %v4702_v21 = vpack.c.bf16 %v2376_v15, %v2375_v9  ;;  %v5022_v22 = vpack.c.bf16 %v2504_v16, %v2503_v10  ;;  %v1417_v23 = vadd.f32 %v6443_v46, %v1416_v19 }
 0x155   : > { %v1929_v24 = vadd.f32 %v6443_v46, %v1928_v20  ;;  %v5601_v25 = vpop.f32.mrf.mxu0  ;;  %v5729_v26 = vpop.f32.mrf.mxu1  ;;  %v2381_v33 = vmax.f32 %v1425_v17, 0.0  ;;  %v2509_v34 = vmax.f32 %v1937_v18, 0.0 }
 0x156   : > { %5306 = vst [vmem:[%s6461_s28 + $0x40] sm:$0xff] %v4702_v21   ;;  %5370 = vst [vmem:[%s6461_s28 + $0x240] sm:$0xff] %v5022_v22   ;;  %v1428_v29 = vadd.f32 %v5601_v25, %v6443_v46  ;;  %v1940_v30 = vadd.f32 %v5729_v26, %v6443_v46  ;;  %v2379_v41 = vmax.f32 %v1417_v23, 0.0 }
 0x157   : > { %v1419_v35 = vpop.f32.mrf.mxu0  ;;  %v1931_v36 = vpop.f32.mrf.mxu1  ;;  %v2507_v42 = vmax.f32 %v1929_v24, 0.0 }
 0x158   : > { %v2382_v37 = vmax.f32 %v1428_v29, 0.0  ;;  %v2510_v38 = vmax.f32 %v1940_v30, 0.0  ;;  %v1420_v39 = vadd.f32 %v6443_v46, %v1419_v35  ;;  %v1932_v40 = vadd.f32 %v6443_v46, %v1931_v36 }
 0x159   : > { %v5604_v43 = vpop.f32.mrf.mxu0  ;;  %5699 = vmatmul.mubr.bf16.gmra.mxu0 %v6041_v27  ;;  %v5732_v44 = vpop.f32.mrf.mxu1  ;;  %5827 = vmatmul.mubr.bf16.gmra.mxu1 %v6042_v28 }
 0x15a   : > { %v4717_v45 = vpack.c.bf16 %v2382_v37, %v2381_v33  ;;  %v5037_v47 = vpack.c.bf16 %v2510_v38, %v2509_v34  ;;  %v2380_v48 = vmax.f32 %v1420_v39, 0.0  ;;  %v2508_v49 = vmax.f32 %v1932_v40, 0.0  ;;  %5702 = vmatprep.mubr.bf16.mxu0 %v6043_v31  ;;  %5830 = vmatprep.mubr.bf16.mxu1 %v6044_v32 }
 0x15b   : > { %v1441_v50 = vadd.f32 %v5604_v43, %v6443_v46  ;;  %v1953_v51 = vadd.f32 %v5732_v44, %v6443_v46  ;;  %v1432_v52 = vpop.f32.mrf.mxu0  ;;  %v1944_v53 = vpop.f32.mrf.mxu1 }
 0x15c   : > { %5309 = vst [vmem:[%s6461_s28 + $0x58] sm:$0xff] %v4717_v45   ;;  %5373 = vst [vmem:[%s6461_s28 + $0x258] sm:$0xff] %v5037_v47   ;;  %v4712_v54 = vpack.c.bf16 %v2380_v48, %v2379_v41  ;;  %v5032_v55 = vpack.c.bf16 %v2508_v49, %v2507_v42  ;;  %v1433_v56 = vadd.f32 %v6443_v46, %v1432_v52 }
 0x15d   : > { %v1945_v57 = vadd.f32 %v6443_v46, %v1944_v53  ;;  %v5605_v58 = vpop.f32.mrf.mxu0  ;;  %v5733_v59 = vpop.f32.mrf.mxu1  ;;  %v2385_v0 = vmax.f32 %v1441_v50, 0.0  ;;  %v2513_v1 = vmax.f32 %v1953_v51, 0.0 }
 0x15e   : > { %5308 = vst [vmem:[%s6461_s28 + $0x50] sm:$0xff] %v4712_v54   ;;  %5372 = vst [vmem:[%s6461_s28 + $0x250] sm:$0xff] %v5032_v55   ;;  %v1444_v62 = vadd.f32 %v5605_v58, %v6443_v46  ;;  %v1956_v63 = vadd.f32 %v5733_v59, %v6443_v46  ;;  %v2383_v8 = vmax.f32 %v1433_v56, 0.0 }
 0x15f   : > { %v1435_v2 = vpop.f32.mrf.mxu0  ;;  %v1947_v3 = vpop.f32.mrf.mxu1  ;;  %v2511_v9 = vmax.f32 %v1945_v57, 0.0 }
 0x160   : > { %v2386_v4 = vmax.f32 %v1444_v62, 0.0  ;;  %v2514_v5 = vmax.f32 %v1956_v63, 0.0  ;;  %v1436_v6 = vadd.f32 %v6443_v46, %v1435_v2  ;;  %v1948_v7 = vadd.f32 %v6443_v46, %v1947_v3 }
 0x161   : > { %v5608_v10 = vpop.f32.mrf.mxu0  ;;  %5703 = vmatmul.mubr.bf16.gmra.mxu0 %v6045_v60  ;;  %v5736_v11 = vpop.f32.mrf.mxu1  ;;  %5831 = vmatmul.mubr.bf16.gmra.mxu1 %v6046_v61 }
 0x162   : > { %v4727_v12 = vpack.c.bf16 %v2386_v4, %v2385_v0  ;;  %v5047_v13 = vpack.c.bf16 %v2514_v5, %v2513_v1  ;;  %v2384_v14 = vmax.f32 %v1436_v6, 0.0  ;;  %v2512_v15 = vmax.f32 %v1948_v7, 0.0 }
 0x163   : > { %v1457_v16 = vadd.f32 %v5608_v10, %v6443_v46  ;;  %v1969_v17 = vadd.f32 %v5736_v11, %v6443_v46  ;;  %v1448_v18 = vpop.f32.mrf.mxu0  ;;  %v1960_v19 = vpop.f32.mrf.mxu1 }
 0x164   : > { %5311 = vst [vmem:[%s6461_s28 + $0x68] sm:$0xff] %v4727_v12   ;;  %5375 = vst [vmem:[%s6461_s28 + $0x268] sm:$0xff] %v5047_v13   ;;  %v4722_v20 = vpack.c.bf16 %v2384_v14, %v2383_v8  ;;  %v5042_v21 = vpack.c.bf16 %v2512_v15, %v2511_v9  ;;  %v1449_v22 = vadd.f32 %v6443_v46, %v1448_v18 }
 0x165   : > { %v1961_v23 = vadd.f32 %v6443_v46, %v1960_v19  ;;  %v5609_v24 = vpop.f32.mrf.mxu0  ;;  %v5737_v25 = vpop.f32.mrf.mxu1  ;;  %v2389_v28 = vmax.f32 %v1457_v16, 0.0  ;;  %v2517_v29 = vmax.f32 %v1969_v17, 0.0 }
 0x166   : > { %5310 = vst [vmem:[%s6461_s28 + $0x60] sm:$0xff] %v4722_v20   ;;  %5374 = vst [vmem:[%s6461_s28 + $0x260] sm:$0xff] %v5042_v21   ;;  %v1460_v26 = vadd.f32 %v5609_v24, %v6443_v46  ;;  %v1972_v27 = vadd.f32 %v5737_v25, %v6443_v46  ;;  %v2387_v36 = vmax.f32 %v1449_v22, 0.0 }
 0x167   : > { %v1451_v30 = vpop.f32.mrf.mxu0  ;;  %v1963_v31 = vpop.f32.mrf.mxu1  ;;  %v2515_v37 = vmax.f32 %v1961_v23, 0.0 }
 0x168   : > { %v2390_v32 = vmax.f32 %v1460_v26, 0.0  ;;  %v2518_v33 = vmax.f32 %v1972_v27, 0.0  ;;  %v1452_v34 = vadd.f32 %v6443_v46, %v1451_v30  ;;  %v1964_v35 = vadd.f32 %v6443_v46, %v1963_v31 }
 0x169   : > { %v5612_v38 = vpop.f32.mrf.mxu0  ;;  %v5740_v39 = vpop.f32.mrf.mxu1 }
 0x16a   : > { %v4737_v40 = vpack.c.bf16 %v2390_v32, %v2389_v28  ;;  %v5057_v41 = vpack.c.bf16 %v2518_v33, %v2517_v29  ;;  %v2388_v42 = vmax.f32 %v1452_v34, 0.0  ;;  %v2516_v43 = vmax.f32 %v1964_v35, 0.0 }
 0x16b   : > { %v1473_v44 = vadd.f32 %v5612_v38, %v6443_v46  ;;  %v1985_v45 = vadd.f32 %v5740_v39, %v6443_v46  ;;  %v1464_v47 = vpop.f32.mrf.mxu0  ;;  %v1976_v48 = vpop.f32.mrf.mxu1 }
 0x16c   : > { %5313 = vst [vmem:[%s6461_s28 + $0x78] sm:$0xff] %v4737_v40   ;;  %5377 = vst [vmem:[%s6461_s28 + $0x278] sm:$0xff] %v5057_v41   ;;  %v4732_v49 = vpack.c.bf16 %v2388_v42, %v2387_v36  ;;  %v5052_v50 = vpack.c.bf16 %v2516_v43, %v2515_v37  ;;  %v1465_v51 = vadd.f32 %v6443_v46, %v1464_v47 }
 0x16d   : > { %v1977_v52 = vadd.f32 %v6443_v46, %v1976_v48  ;;  %v5613_v53 = vpop.f32.mrf.mxu0  ;;  %v5741_v54 = vpop.f32.mrf.mxu1  ;;  %v2393_v57 = vmax.f32 %v1473_v44, 0.0  ;;  %v2521_v58 = vmax.f32 %v1985_v45, 0.0 }
 0x16e   : > { %5312 = vst [vmem:[%s6461_s28 + $0x70] sm:$0xff] %v4732_v49   ;;  %5376 = vst [vmem:[%s6461_s28 + $0x270] sm:$0xff] %v5052_v50   ;;  %v1476_v55 = vadd.f32 %v5613_v53, %v6443_v46  ;;  %v1988_v56 = vadd.f32 %v5741_v54, %v6443_v46  ;;  %v2391_v1 = vmax.f32 %v1465_v51, 0.0 }
 0x16f   : > { %v1467_v59 = vpop.f32.mrf.mxu0  ;;  %v1979_v60 = vpop.f32.mrf.mxu1  ;;  %v2519_v2 = vmax.f32 %v1977_v52, 0.0 }
 0x170   : > { %v2394_v61 = vmax.f32 %v1476_v55, 0.0  ;;  %v2522_v62 = vmax.f32 %v1988_v56, 0.0  ;;  %v1468_v63 = vadd.f32 %v6443_v46, %v1467_v59  ;;  %v1980_v0 = vadd.f32 %v6443_v46, %v1979_v60 }
 0x171   : > { %v5616_v3 = vpop.f32.mrf.mxu0  ;;  %v5744_v4 = vpop.f32.mrf.mxu1 }
 0x172   : > { %v4747_v5 = vpack.c.bf16 %v2394_v61, %v2393_v57  ;;  %v5067_v6 = vpack.c.bf16 %v2522_v62, %v2521_v58  ;;  %v2392_v7 = vmax.f32 %v1468_v63, 0.0  ;;  %v2520_v8 = vmax.f32 %v1980_v0, 0.0 }
 0x173   : > { %v1489_v9 = vadd.f32 %v5616_v3, %v6443_v46  ;;  %v2001_v10 = vadd.f32 %v5744_v4, %v6443_v46  ;;  %v1480_v11 = vpop.f32.mrf.mxu0  ;;  %v1992_v12 = vpop.f32.mrf.mxu1 }
 0x174   : > { %5315 = vst [vmem:[%s6461_s28 + $0x88] sm:$0xff] %v4747_v5   ;;  %5379 = vst [vmem:[%s6461_s28 + $0x288] sm:$0xff] %v5067_v6   ;;  %v4742_v13 = vpack.c.bf16 %v2392_v7, %v2391_v1  ;;  %v5062_v14 = vpack.c.bf16 %v2520_v8, %v2519_v2  ;;  %v1481_v15 = vadd.f32 %v6443_v46, %v1480_v11 }
 0x175   : > { %v1993_v16 = vadd.f32 %v6443_v46, %v1992_v12  ;;  %v5617_v17 = vpop.f32.mrf.mxu0  ;;  %v5745_v18 = vpop.f32.mrf.mxu1  ;;  %v2397_v21 = vmax.f32 %v1489_v9, 0.0  ;;  %v2525_v22 = vmax.f32 %v2001_v10, 0.0 }
 0x176   : > { %5314 = vst [vmem:[%s6461_s28 + $0x80] sm:$0xff] %v4742_v13   ;;  %5378 = vst [vmem:[%s6461_s28 + $0x280] sm:$0xff] %v5062_v14   ;;  %v1492_v19 = vadd.f32 %v5617_v17, %v6443_v46  ;;  %v2004_v20 = vadd.f32 %v5745_v18, %v6443_v46  ;;  %v2395_v29 = vmax.f32 %v1481_v15, 0.0 }
 0x177   : > { %v1483_v23 = vpop.f32.mrf.mxu0  ;;  %v1995_v24 = vpop.f32.mrf.mxu1  ;;  %v2523_v30 = vmax.f32 %v1993_v16, 0.0 }
 0x178   : > { %v2398_v25 = vmax.f32 %v1492_v19, 0.0  ;;  %v2526_v26 = vmax.f32 %v2004_v20, 0.0  ;;  %v1484_v27 = vadd.f32 %v6443_v46, %v1483_v23  ;;  %v1996_v28 = vadd.f32 %v6443_v46, %v1995_v24 }
 0x179   : > { %v5620_v31 = vpop.f32.mrf.mxu0  ;;  %v5748_v32 = vpop.f32.mrf.mxu1 }
 0x17a   : > { %v4757_v33 = vpack.c.bf16 %v2398_v25, %v2397_v21  ;;  %v5077_v34 = vpack.c.bf16 %v2526_v26, %v2525_v22  ;;  %v2396_v35 = vmax.f32 %v1484_v27, 0.0  ;;  %v2524_v36 = vmax.f32 %v1996_v28, 0.0 }
 0x17b   : > { %v1505_v37 = vadd.f32 %v5620_v31, %v6443_v46  ;;  %v2017_v38 = vadd.f32 %v5748_v32, %v6443_v46  ;;  %v1496_v39 = vpop.f32.mrf.mxu0  ;;  %v2008_v40 = vpop.f32.mrf.mxu1 }
 0x17c   : > { %5317 = vst [vmem:[%s6461_s28 + $0x98] sm:$0xff] %v4757_v33   ;;  %5381 = vst [vmem:[%s6461_s28 + $0x298] sm:$0xff] %v5077_v34   ;;  %v4752_v41 = vpack.c.bf16 %v2396_v35, %v2395_v29  ;;  %v5072_v42 = vpack.c.bf16 %v2524_v36, %v2523_v30  ;;  %v1497_v43 = vadd.f32 %v6443_v46, %v1496_v39 }
 0x17d   : > { %v2009_v44 = vadd.f32 %v6443_v46, %v2008_v40  ;;  %v5621_v45 = vpop.f32.mrf.mxu0  ;;  %v5749_v47 = vpop.f32.mrf.mxu1  ;;  %v2401_v50 = vmax.f32 %v1505_v37, 0.0  ;;  %v2529_v51 = vmax.f32 %v2017_v38, 0.0 }
 0x17e   : > { %5316 = vst [vmem:[%s6461_s28 + $0x90] sm:$0xff] %v4752_v41   ;;  %5380 = vst [vmem:[%s6461_s28 + $0x290] sm:$0xff] %v5072_v42   ;;  %v1508_v48 = vadd.f32 %v5621_v45, %v6443_v46  ;;  %v2020_v49 = vadd.f32 %v5749_v47, %v6443_v46  ;;  %v2399_v58 = vmax.f32 %v1497_v43, 0.0 }
 0x17f   : > { %v1499_v52 = vpop.f32.mrf.mxu0  ;;  %v2011_v53 = vpop.f32.mrf.mxu1  ;;  %v2527_v59 = vmax.f32 %v2009_v44, 0.0 }
 0x180   : > { %v2402_v54 = vmax.f32 %v1508_v48, 0.0  ;;  %v2530_v55 = vmax.f32 %v2020_v49, 0.0  ;;  %v1500_v56 = vadd.f32 %v6443_v46, %v1499_v52  ;;  %v2012_v57 = vadd.f32 %v6443_v46, %v2011_v53 }
 0x181   : > { %v5624_v60 = vpop.f32.mrf.mxu0  ;;  %v5752_v61 = vpop.f32.mrf.mxu1 }
 0x182   : > { %v4767_v62 = vpack.c.bf16 %v2402_v54, %v2401_v50  ;;  %v5087_v63 = vpack.c.bf16 %v2530_v55, %v2529_v51  ;;  %v2400_v0 = vmax.f32 %v1500_v56, 0.0  ;;  %v2528_v1 = vmax.f32 %v2012_v57, 0.0 }
 0x183   : > { %v1521_v2 = vadd.f32 %v5624_v60, %v6443_v46  ;;  %v2033_v3 = vadd.f32 %v5752_v61, %v6443_v46  ;;  %v1512_v4 = vpop.f32.mrf.mxu0  ;;  %v2024_v5 = vpop.f32.mrf.mxu1 }
 0x184   : > { %5319 = vst [vmem:[%s6461_s28 + $0xa8] sm:$0xff] %v4767_v62   ;;  %5383 = vst [vmem:[%s6461_s28 + $0x2a8] sm:$0xff] %v5087_v63   ;;  %v4762_v6 = vpack.c.bf16 %v2400_v0, %v2399_v58  ;;  %v5082_v7 = vpack.c.bf16 %v2528_v1, %v2527_v59  ;;  %v1513_v8 = vadd.f32 %v6443_v46, %v1512_v4 }
 0x185   : > { %v2025_v9 = vadd.f32 %v6443_v46, %v2024_v5  ;;  %v5625_v10 = vpop.f32.mrf.mxu0  ;;  %v5753_v11 = vpop.f32.mrf.mxu1  ;;  %v2405_v14 = vmax.f32 %v1521_v2, 0.0  ;;  %v2533_v15 = vmax.f32 %v2033_v3, 0.0 }
 0x186   : > { %5318 = vst [vmem:[%s6461_s28 + $0xa0] sm:$0xff] %v4762_v6   ;;  %5382 = vst [vmem:[%s6461_s28 + $0x2a0] sm:$0xff] %v5082_v7   ;;  %v1524_v12 = vadd.f32 %v5625_v10, %v6443_v46  ;;  %v2036_v13 = vadd.f32 %v5753_v11, %v6443_v46  ;;  %v2403_v22 = vmax.f32 %v1513_v8, 0.0 }
 0x187   : > { %v1515_v16 = vpop.f32.mrf.mxu0  ;;  %v2027_v17 = vpop.f32.mrf.mxu1  ;;  %v2531_v23 = vmax.f32 %v2025_v9, 0.0 }
 0x188   : > { %v2406_v18 = vmax.f32 %v1524_v12, 0.0  ;;  %v2534_v19 = vmax.f32 %v2036_v13, 0.0  ;;  %v1516_v20 = vadd.f32 %v6443_v46, %v1515_v16  ;;  %v2028_v21 = vadd.f32 %v6443_v46, %v2027_v17 }
 0x189   : > { %v5628_v24 = vpop.f32.mrf.mxu0  ;;  %v5756_v25 = vpop.f32.mrf.mxu1 }
 0x18a   : > { %v4777_v26 = vpack.c.bf16 %v2406_v18, %v2405_v14  ;;  %v5097_v27 = vpack.c.bf16 %v2534_v19, %v2533_v15  ;;  %v2404_v28 = vmax.f32 %v1516_v20, 0.0  ;;  %v2532_v29 = vmax.f32 %v2028_v21, 0.0 }
 0x18b   : > { %v1537_v30 = vadd.f32 %v5628_v24, %v6443_v46  ;;  %v2049_v31 = vadd.f32 %v5756_v25, %v6443_v46  ;;  %v1528_v32 = vpop.f32.mrf.mxu0  ;;  %v2040_v33 = vpop.f32.mrf.mxu1 }
 0x18c   : > { %5321 = vst [vmem:[%s6461_s28 + $0xb8] sm:$0xff] %v4777_v26   ;;  %5385 = vst [vmem:[%s6461_s28 + $0x2b8] sm:$0xff] %v5097_v27   ;;  %v4772_v34 = vpack.c.bf16 %v2404_v28, %v2403_v22  ;;  %v5092_v35 = vpack.c.bf16 %v2532_v29, %v2531_v23  ;;  %v1529_v36 = vadd.f32 %v6443_v46, %v1528_v32 }
 0x18d   : > { %v2041_v37 = vadd.f32 %v6443_v46, %v2040_v33  ;;  %v5629_v38 = vpop.f32.mrf.mxu0  ;;  %v5757_v39 = vpop.f32.mrf.mxu1  ;;  %v2409_v42 = vmax.f32 %v1537_v30, 0.0  ;;  %v2537_v43 = vmax.f32 %v2049_v31, 0.0  ;;  %v6650_v33 = vld [vmem:[%s6907_s2] ss:$0 sm:$0xff] }
 0x18e   : > { %5320 = vst [vmem:[%s6461_s28 + $0xb0] sm:$0xff] %v4772_v34   ;;  %5384 = vst [vmem:[%s6461_s28 + $0x2b0] sm:$0xff] %v5092_v35   ;;  %v1540_v40 = vadd.f32 %v5629_v38, %v6443_v46  ;;  %v2052_v41 = vadd.f32 %v5757_v39, %v6443_v46  ;;  %v2407_v51 = vmax.f32 %v1529_v36, 0.0 }
 0x18f   : > { %v1531_v44 = vpop.f32.mrf.mxu0  ;;  %v2043_v45 = vpop.f32.mrf.mxu1  ;;  %v2535_v52 = vmax.f32 %v2041_v37, 0.0 }
 0x190   : > { %v2410_v47 = vmax.f32 %v1540_v40, 0.0  ;;  %v2538_v48 = vmax.f32 %v2052_v41, 0.0  ;;  %v1532_v49 = vadd.f32 %v6443_v46, %v1531_v44  ;;  %v2044_v50 = vadd.f32 %v6443_v46, %v2043_v45 }
 0x191   : > { %v5632_v53 = vpop.f32.mrf.mxu0  ;;  %v5760_v54 = vpop.f32.mrf.mxu1 }
 0x192   : > { %v4787_v55 = vpack.c.bf16 %v2410_v47, %v2409_v42  ;;  %v5107_v56 = vpack.c.bf16 %v2538_v48, %v2537_v43  ;;  %v2408_v57 = vmax.f32 %v1532_v49, 0.0  ;;  %v2536_v58 = vmax.f32 %v2044_v50, 0.0 }
 0x193   : > { %v1553_v59 = vadd.f32 %v5632_v53, %v6443_v46  ;;  %v2065_v60 = vadd.f32 %v5760_v54, %v6443_v46  ;;  %v1544_v61 = vpop.f32.mrf.mxu0  ;;  %v2056_v62 = vpop.f32.mrf.mxu1 }
 0x194   : > { %5323 = vst [vmem:[%s6461_s28 + $0xc8] sm:$0xff] %v4787_v55   ;;  %5387 = vst [vmem:[%s6461_s28 + $0x2c8] sm:$0xff] %v5107_v56   ;;  %v4782_v63 = vpack.c.bf16 %v2408_v57, %v2407_v51  ;;  %v5102_v0 = vpack.c.bf16 %v2536_v58, %v2535_v52  ;;  %v1545_v1 = vadd.f32 %v6443_v46, %v1544_v61 }
 0x195   : > { %v2057_v2 = vadd.f32 %v6443_v46, %v2056_v62  ;;  %v5633_v3 = vpop.f32.mrf.mxu0  ;;  %v5761_v4 = vpop.f32.mrf.mxu1  ;;  %v2413_v7 = vmax.f32 %v1553_v59, 0.0  ;;  %v2541_v8 = vmax.f32 %v2065_v60, 0.0 }
 0x196   : > { %5322 = vst [vmem:[%s6461_s28 + $0xc0] sm:$0xff] %v4782_v63   ;;  %5386 = vst [vmem:[%s6461_s28 + $0x2c0] sm:$0xff] %v5102_v0   ;;  %v1556_v5 = vadd.f32 %v5633_v3, %v6443_v46  ;;  %v2068_v6 = vadd.f32 %v5761_v4, %v6443_v46  ;;  %v2411_v15 = vmax.f32 %v1545_v1, 0.0 }
 0x197   : > { %v1547_v9 = vpop.f32.mrf.mxu0  ;;  %v2059_v10 = vpop.f32.mrf.mxu1  ;;  %v2539_v16 = vmax.f32 %v2057_v2, 0.0 }
 0x198   : > { %v2414_v11 = vmax.f32 %v1556_v5, 0.0  ;;  %v2542_v12 = vmax.f32 %v2068_v6, 0.0  ;;  %v1548_v13 = vadd.f32 %v6443_v46, %v1547_v9  ;;  %v2060_v14 = vadd.f32 %v6443_v46, %v2059_v10 }
 0x199   : > { %v5636_v17 = vpop.f32.mrf.mxu0  ;;  %v5764_v18 = vpop.f32.mrf.mxu1 }
 0x19a   : > { %v4797_v19 = vpack.c.bf16 %v2414_v11, %v2413_v7  ;;  %v5117_v20 = vpack.c.bf16 %v2542_v12, %v2541_v8  ;;  %v2412_v21 = vmax.f32 %v1548_v13, 0.0  ;;  %v2540_v22 = vmax.f32 %v2060_v14, 0.0 }
 0x19b   : > { %v1569_v23 = vadd.f32 %v5636_v17, %v6443_v46  ;;  %v2081_v24 = vadd.f32 %v5764_v18, %v6443_v46  ;;  %v1560_v25 = vpop.f32.mrf.mxu0  ;;  %v2072_v26 = vpop.f32.mrf.mxu1 }
 0x19c   : > { %5325 = vst [vmem:[%s6461_s28 + $0xd8] sm:$0xff] %v4797_v19   ;;  %5389 = vst [vmem:[%s6461_s28 + $0x2d8] sm:$0xff] %v5117_v20   ;;  %v4792_v27 = vpack.c.bf16 %v2412_v21, %v2411_v15  ;;  %v5112_v28 = vpack.c.bf16 %v2540_v22, %v2539_v16  ;;  %v1561_v29 = vadd.f32 %v6443_v46, %v1560_v25 }
 0x19d   : > { %v2073_v30 = vadd.f32 %v6443_v46, %v2072_v26  ;;  %v5637_v31 = vpop.f32.mrf.mxu0  ;;  %v5765_v32 = vpop.f32.mrf.mxu1  ;;  %v2417_v36 = vmax.f32 %v1569_v23, 0.0  ;;  %v2545_v37 = vmax.f32 %v2081_v24, 0.0 }
 0x19e   : > { %5324 = vst [vmem:[%s6461_s28 + $0xd0] sm:$0xff] %v4792_v27   ;;  %5388 = vst [vmem:[%s6461_s28 + $0x2d0] sm:$0xff] %v5112_v28   ;;  %v1572_v34 = vadd.f32 %v6650_v33, %v5637_v31  ;;  %v2084_v35 = vadd.f32 %v6650_v33, %v5765_v32  ;;  %v2415_v43 = vmax.f32 %v1561_v29, 0.0 }
 0x19f   : > { %v1563_v38 = vpop.f32.mrf.mxu0  ;;  %v2075_v39 = vpop.f32.mrf.mxu1  ;;  %v2543_v44 = vmax.f32 %v2073_v30, 0.0 }
 0x1a0   : > { %v2418_v40 = vmax.f32 %v1572_v34, 0.0  ;;  %v2546_v46 = vmax.f32 %v2084_v35, 0.0  ;;  %v1564_v41 = vadd.f32 %v6650_v33, %v1563_v38  ;;  %v2076_v42 = vadd.f32 %v6650_v33, %v2075_v39 }
 0x1a1   : > { %v5640_v45 = vpop.f32.mrf.mxu0  ;;  %v5768_v47 = vpop.f32.mrf.mxu1 }
 0x1a2   : > { %v4807_v48 = vpack.c.bf16 %v2418_v40, %v2417_v36  ;;  %v5127_v49 = vpack.c.bf16 %v2546_v46, %v2545_v37  ;;  %v2416_v50 = vmax.f32 %v1564_v41, 0.0  ;;  %v2544_v51 = vmax.f32 %v2076_v42, 0.0 }
 0x1a3   : > { %v1585_v52 = vadd.f32 %v6650_v33, %v5640_v45  ;;  %v2097_v53 = vadd.f32 %v6650_v33, %v5768_v47  ;;  %v1576_v54 = vpop.f32.mrf.mxu0  ;;  %v2088_v55 = vpop.f32.mrf.mxu1 }
 0x1a4   : > { %5327 = vst [vmem:[%s6461_s28 + $0xe8] sm:$0xff] %v4807_v48   ;;  %5391 = vst [vmem:[%s6461_s28 + $0x2e8] sm:$0xff] %v5127_v49   ;;  %v4802_v56 = vpack.c.bf16 %v2416_v50, %v2415_v43  ;;  %v5122_v57 = vpack.c.bf16 %v2544_v51, %v2543_v44  ;;  %v1577_v58 = vadd.f32 %v6650_v33, %v1576_v54 }
 0x1a5   : > { %v2089_v59 = vadd.f32 %v6650_v33, %v2088_v55  ;;  %v5641_v60 = vpop.f32.mrf.mxu0  ;;  %v5769_v61 = vpop.f32.mrf.mxu1  ;;  %v2421_v0 = vmax.f32 %v1585_v52, 0.0  ;;  %v2549_v1 = vmax.f32 %v2097_v53, 0.0 }
 0x1a6   : > { %5326 = vst [vmem:[%s6461_s28 + $0xe0] sm:$0xff] %v4802_v56   ;;  %5390 = vst [vmem:[%s6461_s28 + $0x2e0] sm:$0xff] %v5122_v57   ;;  %v1588_v62 = vadd.f32 %v6650_v33, %v5641_v60  ;;  %v2100_v63 = vadd.f32 %v6650_v33, %v5769_v61  ;;  %v2419_v8 = vmax.f32 %v1577_v58, 0.0 }
 0x1a7   : > { %v1579_v2 = vpop.f32.mrf.mxu0  ;;  %v2091_v3 = vpop.f32.mrf.mxu1  ;;  %v2547_v9 = vmax.f32 %v2089_v59, 0.0 }
 0x1a8   : > { %v2422_v4 = vmax.f32 %v1588_v62, 0.0  ;;  %v2550_v5 = vmax.f32 %v2100_v63, 0.0  ;;  %v1580_v6 = vadd.f32 %v6650_v33, %v1579_v2  ;;  %v2092_v7 = vadd.f32 %v6650_v33, %v2091_v3 }
 0x1a9   : > { %v5644_v10 = vpop.f32.mrf.mxu0  ;;  %v5772_v11 = vpop.f32.mrf.mxu1 }
 0x1aa   : > { %v4817_v12 = vpack.c.bf16 %v2422_v4, %v2421_v0  ;;  %v5137_v13 = vpack.c.bf16 %v2550_v5, %v2549_v1  ;;  %v2420_v14 = vmax.f32 %v1580_v6, 0.0  ;;  %v2548_v15 = vmax.f32 %v2092_v7, 0.0 }
 0x1ab   : > { %v1601_v16 = vadd.f32 %v6650_v33, %v5644_v10  ;;  %v2113_v17 = vadd.f32 %v6650_v33, %v5772_v11  ;;  %v1592_v18 = vpop.f32.mrf.mxu0  ;;  %v2104_v19 = vpop.f32.mrf.mxu1 }
 0x1ac   : > { %5329 = vst [vmem:[%s6461_s28 + $0xf8] sm:$0xff] %v4817_v12   ;;  %5393 = vst [vmem:[%s6461_s28 + $0x2f8] sm:$0xff] %v5137_v13   ;;  %v4812_v20 = vpack.c.bf16 %v2420_v14, %v2419_v8  ;;  %v5132_v21 = vpack.c.bf16 %v2548_v15, %v2547_v9  ;;  %v1593_v22 = vadd.f32 %v6650_v33, %v1592_v18 }
 0x1ad   : > { %v2105_v23 = vadd.f32 %v6650_v33, %v2104_v19  ;;  %v5645_v24 = vpop.f32.mrf.mxu0  ;;  %v5773_v25 = vpop.f32.mrf.mxu1  ;;  %v2425_v28 = vmax.f32 %v1601_v16, 0.0  ;;  %v2553_v29 = vmax.f32 %v2113_v17, 0.0 }
 0x1ae   : > { %5328 = vst [vmem:[%s6461_s28 + $0xf0] sm:$0xff] %v4812_v20   ;;  %5392 = vst [vmem:[%s6461_s28 + $0x2f0] sm:$0xff] %v5132_v21   ;;  %v1604_v26 = vadd.f32 %v6650_v33, %v5645_v24  ;;  %v2116_v27 = vadd.f32 %v6650_v33, %v5773_v25  ;;  %v2423_v37 = vmax.f32 %v1593_v22, 0.0 }
 0x1af   : > { %v1595_v30 = vpop.f32.mrf.mxu0  ;;  %v2107_v31 = vpop.f32.mrf.mxu1  ;;  %v2551_v38 = vmax.f32 %v2105_v23, 0.0 }
 0x1b0   : > { %v2426_v32 = vmax.f32 %v1604_v26, 0.0  ;;  %v2554_v34 = vmax.f32 %v2116_v27, 0.0  ;;  %v1596_v35 = vadd.f32 %v6650_v33, %v1595_v30  ;;  %v2108_v36 = vadd.f32 %v6650_v33, %v2107_v31 }
 0x1b1   : > { %v5648_v39 = vpop.f32.mrf.mxu0  ;;  %v5776_v40 = vpop.f32.mrf.mxu1 }
 0x1b2   : > { %v4827_v46 = vpack.c.bf16 %v2426_v32, %v2425_v28  ;;  %v5147_v41 = vpack.c.bf16 %v2554_v34, %v2553_v29  ;;  %v2424_v42 = vmax.f32 %v1596_v35, 0.0  ;;  %v2552_v43 = vmax.f32 %v2108_v36, 0.0 }
 0x1b3   : > { %v1617_v44 = vadd.f32 %v6650_v33, %v5648_v39  ;;  %v2129_v45 = vadd.f32 %v6650_v33, %v5776_v40  ;;  %v1608_v47 = vpop.f32.mrf.mxu0  ;;  %v2120_v48 = vpop.f32.mrf.mxu1 }
 0x1b4   : > { %5331 = vst [vmem:[%s6461_s28 + $0x108] sm:$0xff] %v4827_v46   ;;  %5395 = vst [vmem:[%s6461_s28 + $0x308] sm:$0xff] %v5147_v41   ;;  %v4822_v49 = vpack.c.bf16 %v2424_v42, %v2423_v37  ;;  %v5142_v50 = vpack.c.bf16 %v2552_v43, %v2551_v38  ;;  %v1609_v51 = vadd.f32 %v6650_v33, %v1608_v47 }
 0x1b5   : > { %v2121_v52 = vadd.f32 %v6650_v33, %v2120_v48  ;;  %v5649_v53 = vpop.f32.mrf.mxu0  ;;  %v5777_v54 = vpop.f32.mrf.mxu1  ;;  %v2429_v57 = vmax.f32 %v1617_v44, 0.0  ;;  %v2557_v58 = vmax.f32 %v2129_v45, 0.0 }
 0x1b6   : > { %5330 = vst [vmem:[%s6461_s28 + $0x100] sm:$0xff] %v4822_v49   ;;  %5394 = vst [vmem:[%s6461_s28 + $0x300] sm:$0xff] %v5142_v50   ;;  %v1620_v55 = vadd.f32 %v6650_v33, %v5649_v53  ;;  %v2132_v56 = vadd.f32 %v6650_v33, %v5777_v54  ;;  %v2427_v1 = vmax.f32 %v1609_v51, 0.0 }
 0x1b7   : > { %v1611_v59 = vpop.f32.mrf.mxu0  ;;  %v2123_v60 = vpop.f32.mrf.mxu1  ;;  %v2555_v2 = vmax.f32 %v2121_v52, 0.0 }
 0x1b8   : > { %v2430_v61 = vmax.f32 %v1620_v55, 0.0  ;;  %v2558_v62 = vmax.f32 %v2132_v56, 0.0  ;;  %v1612_v63 = vadd.f32 %v6650_v33, %v1611_v59  ;;  %v2124_v0 = vadd.f32 %v6650_v33, %v2123_v60 }
 0x1b9   : > { %v5652_v3 = vpop.f32.mrf.mxu0  ;;  %v5780_v4 = vpop.f32.mrf.mxu1 }
 0x1ba   : > { %v4837_v5 = vpack.c.bf16 %v2430_v61, %v2429_v57  ;;  %v5157_v6 = vpack.c.bf16 %v2558_v62, %v2557_v58  ;;  %v2428_v7 = vmax.f32 %v1612_v63, 0.0  ;;  %v2556_v8 = vmax.f32 %v2124_v0, 0.0 }
 0x1bb   : > { %v1633_v9 = vadd.f32 %v6650_v33, %v5652_v3  ;;  %v2145_v10 = vadd.f32 %v6650_v33, %v5780_v4  ;;  %v1624_v11 = vpop.f32.mrf.mxu0  ;;  %v2136_v12 = vpop.f32.mrf.mxu1 }
 0x1bc   : > { %5333 = vst [vmem:[%s6461_s28 + $0x118] sm:$0xff] %v4837_v5   ;;  %5397 = vst [vmem:[%s6461_s28 + $0x318] sm:$0xff] %v5157_v6   ;;  %v4832_v13 = vpack.c.bf16 %v2428_v7, %v2427_v1  ;;  %v5152_v14 = vpack.c.bf16 %v2556_v8, %v2555_v2  ;;  %v1625_v15 = vadd.f32 %v6650_v33, %v1624_v11 }
 0x1bd   : > { %v2137_v16 = vadd.f32 %v6650_v33, %v2136_v12  ;;  %v5653_v17 = vpop.f32.mrf.mxu0  ;;  %v5781_v18 = vpop.f32.mrf.mxu1  ;;  %v2433_v21 = vmax.f32 %v1633_v9, 0.0  ;;  %v2561_v22 = vmax.f32 %v2145_v10, 0.0 }
 0x1be   : > { %5332 = vst [vmem:[%s6461_s28 + $0x110] sm:$0xff] %v4832_v13   ;;  %5396 = vst [vmem:[%s6461_s28 + $0x310] sm:$0xff] %v5152_v14   ;;  %v1636_v19 = vadd.f32 %v6650_v33, %v5653_v17  ;;  %v2148_v20 = vadd.f32 %v6650_v33, %v5781_v18  ;;  %v2431_v29 = vmax.f32 %v1625_v15, 0.0 }
 0x1bf   : > { %v1627_v23 = vpop.f32.mrf.mxu0  ;;  %v2139_v24 = vpop.f32.mrf.mxu1  ;;  %v2559_v30 = vmax.f32 %v2137_v16, 0.0 }
 0x1c0   : > { %v2434_v25 = vmax.f32 %v1636_v19, 0.0  ;;  %v2562_v26 = vmax.f32 %v2148_v20, 0.0  ;;  %v1628_v27 = vadd.f32 %v6650_v33, %v1627_v23  ;;  %v2140_v28 = vadd.f32 %v6650_v33, %v2139_v24 }
 0x1c1   : > { %v5656_v31 = vpop.f32.mrf.mxu0  ;;  %v5784_v32 = vpop.f32.mrf.mxu1 }
 0x1c2   : > { %v4847_v34 = vpack.c.bf16 %v2434_v25, %v2433_v21  ;;  %v5167_v35 = vpack.c.bf16 %v2562_v26, %v2561_v22  ;;  %v2432_v36 = vmax.f32 %v1628_v27, 0.0  ;;  %v2560_v37 = vmax.f32 %v2140_v28, 0.0 }
 0x1c3   : > { %v1649_v38 = vadd.f32 %v6650_v33, %v5656_v31  ;;  %v2161_v39 = vadd.f32 %v6650_v33, %v5784_v32  ;;  %v1640_v40 = vpop.f32.mrf.mxu0  ;;  %v2152_v46 = vpop.f32.mrf.mxu1 }
 0x1c4   : > { %5335 = vst [vmem:[%s6461_s28 + $0x128] sm:$0xff] %v4847_v34   ;;  %5399 = vst [vmem:[%s6461_s28 + $0x328] sm:$0xff] %v5167_v35   ;;  %v4842_v41 = vpack.c.bf16 %v2432_v36, %v2431_v29  ;;  %v5162_v42 = vpack.c.bf16 %v2560_v37, %v2559_v30  ;;  %v1641_v43 = vadd.f32 %v6650_v33, %v1640_v40 }
 0x1c5   : > { %v2153_v44 = vadd.f32 %v6650_v33, %v2152_v46  ;;  %v5657_v45 = vpop.f32.mrf.mxu0  ;;  %v5785_v47 = vpop.f32.mrf.mxu1  ;;  %v2437_v50 = vmax.f32 %v1649_v38, 0.0  ;;  %v2565_v51 = vmax.f32 %v2161_v39, 0.0 }
 0x1c6   : > { %5334 = vst [vmem:[%s6461_s28 + $0x120] sm:$0xff] %v4842_v41   ;;  %5398 = vst [vmem:[%s6461_s28 + $0x320] sm:$0xff] %v5162_v42   ;;  %v1652_v48 = vadd.f32 %v6650_v33, %v5657_v45  ;;  %v2164_v49 = vadd.f32 %v6650_v33, %v5785_v47  ;;  %v2435_v58 = vmax.f32 %v1641_v43, 0.0 }
 0x1c7   : > { %v1643_v52 = vpop.f32.mrf.mxu0  ;;  %v2155_v53 = vpop.f32.mrf.mxu1  ;;  %v2563_v59 = vmax.f32 %v2153_v44, 0.0 }
 0x1c8   : > { %v2438_v54 = vmax.f32 %v1652_v48, 0.0  ;;  %v2566_v55 = vmax.f32 %v2164_v49, 0.0  ;;  %v1644_v56 = vadd.f32 %v6650_v33, %v1643_v52  ;;  %v2156_v57 = vadd.f32 %v6650_v33, %v2155_v53 }
 0x1c9   : > { %v5660_v60 = vpop.f32.mrf.mxu0  ;;  %v5788_v61 = vpop.f32.mrf.mxu1 }
 0x1ca   : > { %v4857_v62 = vpack.c.bf16 %v2438_v54, %v2437_v50  ;;  %v5177_v63 = vpack.c.bf16 %v2566_v55, %v2565_v51  ;;  %v2436_v0 = vmax.f32 %v1644_v56, 0.0  ;;  %v2564_v1 = vmax.f32 %v2156_v57, 0.0 }
 0x1cb   : > { %v1665_v2 = vadd.f32 %v6650_v33, %v5660_v60  ;;  %v2177_v3 = vadd.f32 %v6650_v33, %v5788_v61  ;;  %v1656_v4 = vpop.f32.mrf.mxu0  ;;  %v2168_v5 = vpop.f32.mrf.mxu1 }
 0x1cc   : > { %5337 = vst [vmem:[%s6461_s28 + $0x138] sm:$0xff] %v4857_v62   ;;  %5401 = vst [vmem:[%s6461_s28 + $0x338] sm:$0xff] %v5177_v63   ;;  %v4852_v6 = vpack.c.bf16 %v2436_v0, %v2435_v58  ;;  %v5172_v7 = vpack.c.bf16 %v2564_v1, %v2563_v59  ;;  %v1657_v8 = vadd.f32 %v6650_v33, %v1656_v4 }
 0x1cd   : > { %v2169_v9 = vadd.f32 %v6650_v33, %v2168_v5  ;;  %v5661_v10 = vpop.f32.mrf.mxu0  ;;  %v5789_v11 = vpop.f32.mrf.mxu1  ;;  %v2441_v14 = vmax.f32 %v1665_v2, 0.0  ;;  %v2569_v15 = vmax.f32 %v2177_v3, 0.0 }
 0x1ce   : > { %5336 = vst [vmem:[%s6461_s28 + $0x130] sm:$0xff] %v4852_v6   ;;  %5400 = vst [vmem:[%s6461_s28 + $0x330] sm:$0xff] %v5172_v7   ;;  %v1668_v12 = vadd.f32 %v6650_v33, %v5661_v10  ;;  %v2180_v13 = vadd.f32 %v6650_v33, %v5789_v11  ;;  %v2439_v22 = vmax.f32 %v1657_v8, 0.0 }
 0x1cf   : > { %v1659_v16 = vpop.f32.mrf.mxu0  ;;  %v2171_v17 = vpop.f32.mrf.mxu1  ;;  %v2567_v23 = vmax.f32 %v2169_v9, 0.0 }
 0x1d0   : > { %v2442_v18 = vmax.f32 %v1668_v12, 0.0  ;;  %v2570_v19 = vmax.f32 %v2180_v13, 0.0  ;;  %v1660_v20 = vadd.f32 %v6650_v33, %v1659_v16  ;;  %v2172_v21 = vadd.f32 %v6650_v33, %v2171_v17 }
 0x1d1   : > { %v5664_v24 = vpop.f32.mrf.mxu0  ;;  %v5792_v25 = vpop.f32.mrf.mxu1 }
 0x1d2   : > { %v4867_v26 = vpack.c.bf16 %v2442_v18, %v2441_v14  ;;  %v5187_v27 = vpack.c.bf16 %v2570_v19, %v2569_v15  ;;  %v2440_v28 = vmax.f32 %v1660_v20, 0.0  ;;  %v2568_v29 = vmax.f32 %v2172_v21, 0.0 }
 0x1d3   : > { %v1681_v30 = vadd.f32 %v6650_v33, %v5664_v24  ;;  %v2193_v31 = vadd.f32 %v6650_v33, %v5792_v25  ;;  %v1672_v32 = vpop.f32.mrf.mxu0  ;;  %v2184_v34 = vpop.f32.mrf.mxu1 }
 0x1d4   : > { %5339 = vst [vmem:[%s6461_s28 + $0x148] sm:$0xff] %v4867_v26   ;;  %5403 = vst [vmem:[%s6461_s28 + $0x348] sm:$0xff] %v5187_v27   ;;  %v4862_v35 = vpack.c.bf16 %v2440_v28, %v2439_v22  ;;  %v5182_v36 = vpack.c.bf16 %v2568_v29, %v2567_v23  ;;  %v1673_v37 = vadd.f32 %v6650_v33, %v1672_v32 }
 0x1d5   : > { %v2185_v38 = vadd.f32 %v6650_v33, %v2184_v34  ;;  %v5665_v39 = vpop.f32.mrf.mxu0  ;;  %v5793_v40 = vpop.f32.mrf.mxu1  ;;  %v2445_v42 = vmax.f32 %v1681_v30, 0.0  ;;  %v2573_v43 = vmax.f32 %v2193_v31, 0.0 }
 0x1d6   : > { %5338 = vst [vmem:[%s6461_s28 + $0x140] sm:$0xff] %v4862_v35   ;;  %5402 = vst [vmem:[%s6461_s28 + $0x340] sm:$0xff] %v5182_v36   ;;  %v1684_v46 = vadd.f32 %v6650_v33, %v5665_v39  ;;  %v2196_v41 = vadd.f32 %v6650_v33, %v5793_v40  ;;  %v2443_v51 = vmax.f32 %v1673_v37, 0.0 }
 0x1d7   : > { %v1675_v44 = vpop.f32.mrf.mxu0  ;;  %v2187_v45 = vpop.f32.mrf.mxu1  ;;  %v2571_v52 = vmax.f32 %v2185_v38, 0.0 }
 0x1d8   : > { %v2446_v47 = vmax.f32 %v1684_v46, 0.0  ;;  %v2574_v48 = vmax.f32 %v2196_v41, 0.0  ;;  %v1676_v49 = vadd.f32 %v6650_v33, %v1675_v44  ;;  %v2188_v50 = vadd.f32 %v6650_v33, %v2187_v45 }
 0x1d9   : > { %v5668_v53 = vpop.f32.mrf.mxu0  ;;  %v5796_v54 = vpop.f32.mrf.mxu1 }
 0x1da   : > { %v4877_v55 = vpack.c.bf16 %v2446_v47, %v2445_v42  ;;  %v5197_v56 = vpack.c.bf16 %v2574_v48, %v2573_v43  ;;  %v2444_v57 = vmax.f32 %v1676_v49, 0.0  ;;  %v2572_v58 = vmax.f32 %v2188_v50, 0.0 }
 0x1db   : > { %v1697_v59 = vadd.f32 %v6650_v33, %v5668_v53  ;;  %v2209_v60 = vadd.f32 %v6650_v33, %v5796_v54  ;;  %v1688_v61 = vpop.f32.mrf.mxu0  ;;  %v2200_v62 = vpop.f32.mrf.mxu1 }
 0x1dc   : > { %5341 = vst [vmem:[%s6461_s28 + $0x158] sm:$0xff] %v4877_v55   ;;  %5405 = vst [vmem:[%s6461_s28 + $0x358] sm:$0xff] %v5197_v56   ;;  %v4872_v63 = vpack.c.bf16 %v2444_v57, %v2443_v51  ;;  %v5192_v0 = vpack.c.bf16 %v2572_v58, %v2571_v52  ;;  %v1689_v1 = vadd.f32 %v6650_v33, %v1688_v61 }
 0x1dd   : > { %v2201_v2 = vadd.f32 %v6650_v33, %v2200_v62  ;;  %v5669_v3 = vpop.f32.mrf.mxu0  ;;  %v5797_v4 = vpop.f32.mrf.mxu1  ;;  %v2449_v7 = vmax.f32 %v1697_v59, 0.0  ;;  %v2577_v8 = vmax.f32 %v2209_v60, 0.0 }
 0x1de   : > { %5340 = vst [vmem:[%s6461_s28 + $0x150] sm:$0xff] %v4872_v63   ;;  %5404 = vst [vmem:[%s6461_s28 + $0x350] sm:$0xff] %v5192_v0   ;;  %v1700_v5 = vadd.f32 %v6650_v33, %v5669_v3  ;;  %v2212_v6 = vadd.f32 %v6650_v33, %v5797_v4  ;;  %v2447_v15 = vmax.f32 %v1689_v1, 0.0 }
 0x1df   : > { %v1691_v9 = vpop.f32.mrf.mxu0  ;;  %v2203_v10 = vpop.f32.mrf.mxu1  ;;  %v2575_v16 = vmax.f32 %v2201_v2, 0.0 }
 0x1e0   : > { %v2450_v11 = vmax.f32 %v1700_v5, 0.0  ;;  %v2578_v12 = vmax.f32 %v2212_v6, 0.0  ;;  %v1692_v13 = vadd.f32 %v6650_v33, %v1691_v9  ;;  %v2204_v14 = vadd.f32 %v6650_v33, %v2203_v10 }
 0x1e1   : > { %v5672_v17 = vpop.f32.mrf.mxu0  ;;  %v5800_v18 = vpop.f32.mrf.mxu1 }
 0x1e2   : > { %v4887_v19 = vpack.c.bf16 %v2450_v11, %v2449_v7  ;;  %v5207_v20 = vpack.c.bf16 %v2578_v12, %v2577_v8  ;;  %v2448_v21 = vmax.f32 %v1692_v13, 0.0  ;;  %v2576_v22 = vmax.f32 %v2204_v14, 0.0 }
 0x1e3   : > { %v1713_v23 = vadd.f32 %v6650_v33, %v5672_v17  ;;  %v2225_v24 = vadd.f32 %v6650_v33, %v5800_v18  ;;  %v1704_v25 = vpop.f32.mrf.mxu0  ;;  %v2216_v26 = vpop.f32.mrf.mxu1 }
 0x1e4   : > { %5343 = vst [vmem:[%s6461_s28 + $0x168] sm:$0xff] %v4887_v19   ;;  %5407 = vst [vmem:[%s6461_s28 + $0x368] sm:$0xff] %v5207_v20   ;;  %v4882_v27 = vpack.c.bf16 %v2448_v21, %v2447_v15  ;;  %v5202_v28 = vpack.c.bf16 %v2576_v22, %v2575_v16  ;;  %v1705_v29 = vadd.f32 %v6650_v33, %v1704_v25 }
 0x1e5   : > { %v2217_v30 = vadd.f32 %v6650_v33, %v2216_v26  ;;  %v5673_v31 = vpop.f32.mrf.mxu0  ;;  %v5801_v32 = vpop.f32.mrf.mxu1  ;;  %v2453_v36 = vmax.f32 %v1713_v23, 0.0  ;;  %v2581_v37 = vmax.f32 %v2225_v24, 0.0 }
 0x1e6   : > { %5342 = vst [vmem:[%s6461_s28 + $0x160] sm:$0xff] %v4882_v27   ;;  %5406 = vst [vmem:[%s6461_s28 + $0x360] sm:$0xff] %v5202_v28   ;;  %v1716_v34 = vadd.f32 %v6650_v33, %v5673_v31  ;;  %v2228_v35 = vadd.f32 %v6650_v33, %v5801_v32  ;;  %v2451_v43 = vmax.f32 %v1705_v29, 0.0 }
 0x1e7   : > { %v1707_v38 = vpop.f32.mrf.mxu0  ;;  %v2219_v39 = vpop.f32.mrf.mxu1  ;;  %v2579_v44 = vmax.f32 %v2217_v30, 0.0 }
 0x1e8   : > { %v2454_v40 = vmax.f32 %v1716_v34, 0.0  ;;  %v2582_v46 = vmax.f32 %v2228_v35, 0.0  ;;  %v1708_v41 = vadd.f32 %v6650_v33, %v1707_v38  ;;  %v2220_v42 = vadd.f32 %v6650_v33, %v2219_v39 }
 0x1e9   : > { %v5676_v45 = vpop.f32.mrf.mxu0  ;;  %v5804_v47 = vpop.f32.mrf.mxu1 }
 0x1ea   : > { %v4897_v48 = vpack.c.bf16 %v2454_v40, %v2453_v36  ;;  %v5217_v49 = vpack.c.bf16 %v2582_v46, %v2581_v37  ;;  %v2452_v50 = vmax.f32 %v1708_v41, 0.0  ;;  %v2580_v51 = vmax.f32 %v2220_v42, 0.0 }
 0x1eb   : > { %v1729_v52 = vadd.f32 %v6650_v33, %v5676_v45  ;;  %v2241_v53 = vadd.f32 %v6650_v33, %v5804_v47  ;;  %v1720_v54 = vpop.f32.mrf.mxu0  ;;  %v2232_v55 = vpop.f32.mrf.mxu1 }
 0x1ec   : > { %5345 = vst [vmem:[%s6461_s28 + $0x178] sm:$0xff] %v4897_v48   ;;  %5409 = vst [vmem:[%s6461_s28 + $0x378] sm:$0xff] %v5217_v49   ;;  %v4892_v56 = vpack.c.bf16 %v2452_v50, %v2451_v43  ;;  %v5212_v57 = vpack.c.bf16 %v2580_v51, %v2579_v44  ;;  %v1721_v58 = vadd.f32 %v6650_v33, %v1720_v54 }
 0x1ed   : > { %v2233_v59 = vadd.f32 %v6650_v33, %v2232_v55  ;;  %v5677_v60 = vpop.f32.mrf.mxu0  ;;  %v5805_v61 = vpop.f32.mrf.mxu1  ;;  %v2457_v0 = vmax.f32 %v1729_v52, 0.0  ;;  %v2585_v1 = vmax.f32 %v2241_v53, 0.0 }
 0x1ee   : > { %5344 = vst [vmem:[%s6461_s28 + $0x170] sm:$0xff] %v4892_v56   ;;  %5408 = vst [vmem:[%s6461_s28 + $0x370] sm:$0xff] %v5212_v57   ;;  %v1732_v62 = vadd.f32 %v6650_v33, %v5677_v60  ;;  %v2244_v63 = vadd.f32 %v6650_v33, %v5805_v61  ;;  %v2455_v8 = vmax.f32 %v1721_v58, 0.0 }
 0x1ef   : > { %v1723_v2 = vpop.f32.mrf.mxu0  ;;  %v2235_v3 = vpop.f32.mrf.mxu1  ;;  %v2583_v9 = vmax.f32 %v2233_v59, 0.0 }
 0x1f0   : > { %v2458_v4 = vmax.f32 %v1732_v62, 0.0  ;;  %v2586_v5 = vmax.f32 %v2244_v63, 0.0  ;;  %v1724_v6 = vadd.f32 %v6650_v33, %v1723_v2  ;;  %v2236_v7 = vadd.f32 %v6650_v33, %v2235_v3 }
 0x1f1   : > { %v5680_v10 = vpop.f32.mrf.mxu0  ;;  %v5808_v11 = vpop.f32.mrf.mxu1 }
 0x1f2   : > { %v4907_v12 = vpack.c.bf16 %v2458_v4, %v2457_v0  ;;  %v5227_v13 = vpack.c.bf16 %v2586_v5, %v2585_v1  ;;  %v2456_v14 = vmax.f32 %v1724_v6, 0.0  ;;  %v2584_v15 = vmax.f32 %v2236_v7, 0.0 }
 0x1f3   : > { %v1745_v16 = vadd.f32 %v6650_v33, %v5680_v10  ;;  %v2257_v17 = vadd.f32 %v6650_v33, %v5808_v11  ;;  %v1736_v18 = vpop.f32.mrf.mxu0  ;;  %v2248_v19 = vpop.f32.mrf.mxu1 }
 0x1f4   : > { %5347 = vst [vmem:[%s6461_s28 + $0x188] sm:$0xff] %v4907_v12   ;;  %5411 = vst [vmem:[%s6461_s28 + $0x388] sm:$0xff] %v5227_v13   ;;  %v4902_v20 = vpack.c.bf16 %v2456_v14, %v2455_v8  ;;  %v5222_v21 = vpack.c.bf16 %v2584_v15, %v2583_v9  ;;  %v1737_v22 = vadd.f32 %v6650_v33, %v1736_v18 }
 0x1f5   : > { %v2249_v23 = vadd.f32 %v6650_v33, %v2248_v19  ;;  %v5681_v24 = vpop.f32.mrf.mxu0  ;;  %v5809_v25 = vpop.f32.mrf.mxu1  ;;  %v2461_v28 = vmax.f32 %v1745_v16, 0.0  ;;  %v2589_v29 = vmax.f32 %v2257_v17, 0.0 }
 0x1f6   : > { %5346 = vst [vmem:[%s6461_s28 + $0x180] sm:$0xff] %v4902_v20   ;;  %5410 = vst [vmem:[%s6461_s28 + $0x380] sm:$0xff] %v5222_v21   ;;  %v1748_v26 = vadd.f32 %v6650_v33, %v5681_v24  ;;  %v2260_v27 = vadd.f32 %v6650_v33, %v5809_v25  ;;  %v2459_v37 = vmax.f32 %v1737_v22, 0.0 }
 0x1f7   : > { %v1739_v30 = vpop.f32.mrf.mxu0  ;;  %v2251_v31 = vpop.f32.mrf.mxu1  ;;  %v2587_v38 = vmax.f32 %v2249_v23, 0.0 }
 0x1f8   : > { %v2462_v32 = vmax.f32 %v1748_v26, 0.0  ;;  %v2590_v34 = vmax.f32 %v2260_v27, 0.0  ;;  %v1740_v35 = vadd.f32 %v6650_v33, %v1739_v30  ;;  %v2252_v36 = vadd.f32 %v6650_v33, %v2251_v31 }
 0x1f9   : > { %v5684_v39 = vpop.f32.mrf.mxu0  ;;  %v5812_v40 = vpop.f32.mrf.mxu1 }
 0x1fa   : > { %v4917_v46 = vpack.c.bf16 %v2462_v32, %v2461_v28  ;;  %v5237_v41 = vpack.c.bf16 %v2590_v34, %v2589_v29  ;;  %v2460_v42 = vmax.f32 %v1740_v35, 0.0  ;;  %v2588_v43 = vmax.f32 %v2252_v36, 0.0 }
 0x1fb   : > { %v1761_v44 = vadd.f32 %v6650_v33, %v5684_v39  ;;  %v2273_v45 = vadd.f32 %v6650_v33, %v5812_v40  ;;  %v1752_v47 = vpop.f32.mrf.mxu0  ;;  %v2264_v48 = vpop.f32.mrf.mxu1 }
 0x1fc   : > { %5349 = vst [vmem:[%s6461_s28 + $0x198] sm:$0xff] %v4917_v46   ;;  %5413 = vst [vmem:[%s6461_s28 + $0x398] sm:$0xff] %v5237_v41   ;;  %v4912_v49 = vpack.c.bf16 %v2460_v42, %v2459_v37  ;;  %v5232_v50 = vpack.c.bf16 %v2588_v43, %v2587_v38  ;;  %v1753_v51 = vadd.f32 %v6650_v33, %v1752_v47 }
 0x1fd   : > { %v2265_v52 = vadd.f32 %v6650_v33, %v2264_v48  ;;  %v5685_v53 = vpop.f32.mrf.mxu0  ;;  %v5813_v54 = vpop.f32.mrf.mxu1  ;;  %v2465_v57 = vmax.f32 %v1761_v44, 0.0  ;;  %v2593_v58 = vmax.f32 %v2273_v45, 0.0 }
 0x1fe   : > { %5348 = vst [vmem:[%s6461_s28 + $0x190] sm:$0xff] %v4912_v49   ;;  %5412 = vst [vmem:[%s6461_s28 + $0x390] sm:$0xff] %v5232_v50   ;;  %v1764_v55 = vadd.f32 %v6650_v33, %v5685_v53  ;;  %v2276_v56 = vadd.f32 %v6650_v33, %v5813_v54  ;;  %v2463_v1 = vmax.f32 %v1753_v51, 0.0 }
 0x1ff   : > { %v1755_v59 = vpop.f32.mrf.mxu0  ;;  %v2267_v60 = vpop.f32.mrf.mxu1  ;;  %v2591_v2 = vmax.f32 %v2265_v52, 0.0 }
 0x200   : > { %v2466_v61 = vmax.f32 %v1764_v55, 0.0  ;;  %v2594_v62 = vmax.f32 %v2276_v56, 0.0  ;;  %v1756_v63 = vadd.f32 %v6650_v33, %v1755_v59  ;;  %v2268_v0 = vadd.f32 %v6650_v33, %v2267_v60 }
 0x201   : > { %v5688_v3 = vpop.f32.mrf.mxu0  ;;  %v5816_v4 = vpop.f32.mrf.mxu1 }
 0x202   : > { %v4927_v5 = vpack.c.bf16 %v2466_v61, %v2465_v57  ;;  %v5247_v6 = vpack.c.bf16 %v2594_v62, %v2593_v58  ;;  %v2464_v7 = vmax.f32 %v1756_v63, 0.0  ;;  %v2592_v8 = vmax.f32 %v2268_v0, 0.0 }
 0x203   : > { %v1777_v9 = vadd.f32 %v6650_v33, %v5688_v3  ;;  %v2289_v10 = vadd.f32 %v6650_v33, %v5816_v4  ;;  %v1768_v11 = vpop.f32.mrf.mxu0  ;;  %v2280_v12 = vpop.f32.mrf.mxu1 }
 0x204   : > { %5351 = vst [vmem:[%s6461_s28 + $0x1a8] sm:$0xff] %v4927_v5   ;;  %5415 = vst [vmem:[%s6461_s28 + $0x3a8] sm:$0xff] %v5247_v6   ;;  %v4922_v13 = vpack.c.bf16 %v2464_v7, %v2463_v1  ;;  %v5242_v14 = vpack.c.bf16 %v2592_v8, %v2591_v2  ;;  %v1769_v15 = vadd.f32 %v6650_v33, %v1768_v11 }
 0x205   : > { %v2281_v16 = vadd.f32 %v6650_v33, %v2280_v12  ;;  %v5689_v17 = vpop.f32.mrf.mxu0  ;;  %v5817_v18 = vpop.f32.mrf.mxu1  ;;  %v2469_v21 = vmax.f32 %v1777_v9, 0.0  ;;  %v2597_v22 = vmax.f32 %v2289_v10, 0.0 }
 0x206   : > { %5350 = vst [vmem:[%s6461_s28 + $0x1a0] sm:$0xff] %v4922_v13   ;;  %5414 = vst [vmem:[%s6461_s28 + $0x3a0] sm:$0xff] %v5242_v14   ;;  %v1780_v19 = vadd.f32 %v6650_v33, %v5689_v17  ;;  %v2292_v20 = vadd.f32 %v6650_v33, %v5817_v18  ;;  %v2467_v29 = vmax.f32 %v1769_v15, 0.0 }
 0x207   : > { %v1771_v23 = vpop.f32.mrf.mxu0  ;;  %v2283_v24 = vpop.f32.mrf.mxu1  ;;  %v2595_v30 = vmax.f32 %v2281_v16, 0.0 }
 0x208   : > { %v2470_v25 = vmax.f32 %v1780_v19, 0.0  ;;  %v2598_v26 = vmax.f32 %v2292_v20, 0.0  ;;  %v1772_v27 = vadd.f32 %v6650_v33, %v1771_v23  ;;  %v2284_v28 = vadd.f32 %v6650_v33, %v2283_v24 }
 0x209   : > { %v5692_v31 = vpop.f32.mrf.mxu0  ;;  %v5820_v32 = vpop.f32.mrf.mxu1 }
 0x20a   : > { %v4937_v34 = vpack.c.bf16 %v2470_v25, %v2469_v21  ;;  %v5257_v35 = vpack.c.bf16 %v2598_v26, %v2597_v22  ;;  %v2468_v36 = vmax.f32 %v1772_v27, 0.0  ;;  %v2596_v37 = vmax.f32 %v2284_v28, 0.0 }
 0x20b   : > { %v1793_v38 = vadd.f32 %v6650_v33, %v5692_v31  ;;  %v2305_v39 = vadd.f32 %v6650_v33, %v5820_v32  ;;  %v1784_v40 = vpop.f32.mrf.mxu0  ;;  %v2296_v46 = vpop.f32.mrf.mxu1 }
 0x20c   : > { %5353 = vst [vmem:[%s6461_s28 + $0x1b8] sm:$0xff] %v4937_v34   ;;  %5417 = vst [vmem:[%s6461_s28 + $0x3b8] sm:$0xff] %v5257_v35   ;;  %v4932_v41 = vpack.c.bf16 %v2468_v36, %v2467_v29  ;;  %v5252_v42 = vpack.c.bf16 %v2596_v37, %v2595_v30  ;;  %v1785_v43 = vadd.f32 %v6650_v33, %v1784_v40 }
 0x20d   : > { %v2297_v44 = vadd.f32 %v6650_v33, %v2296_v46  ;;  %v5693_v45 = vpop.f32.mrf.mxu0  ;;  %v5821_v47 = vpop.f32.mrf.mxu1  ;;  %v2473_v50 = vmax.f32 %v1793_v38, 0.0  ;;  %v2601_v51 = vmax.f32 %v2305_v39, 0.0  ;;  %v6048_v46 = vld [vmem:[%s6907_s2] ss:$0 sm:$0xff] }
 0x20e   : > { %5352 = vst [vmem:[%s6461_s28 + $0x1b0] sm:$0xff] %v4932_v41   ;;  %5416 = vst [vmem:[%s6461_s28 + $0x3b0] sm:$0xff] %v5252_v42   ;;  %v1796_v48 = vadd.f32 %v6650_v33, %v5693_v45  ;;  %v2308_v49 = vadd.f32 %v6650_v33, %v5821_v47  ;;  %v2471_v58 = vmax.f32 %v1785_v43, 0.0 }
 0x20f   : > { %v1787_v52 = vpop.f32.mrf.mxu0  ;;  %v2299_v53 = vpop.f32.mrf.mxu1  ;;  %v2599_v59 = vmax.f32 %v2297_v44, 0.0 }
 0x210   : > { %v2474_v54 = vmax.f32 %v1796_v48, 0.0  ;;  %v2602_v55 = vmax.f32 %v2308_v49, 0.0  ;;  %v1788_v56 = vadd.f32 %v6650_v33, %v1787_v52  ;;  %v2300_v57 = vadd.f32 %v6650_v33, %v2299_v53 }
 0x211   : > { %v5696_v60 = vpop.f32.mrf.mxu0  ;;  %v5824_v61 = vpop.f32.mrf.mxu1 }
 0x212   : > { %v4947_v62 = vpack.c.bf16 %v2474_v54, %v2473_v50  ;;  %v5267_v63 = vpack.c.bf16 %v2602_v55, %v2601_v51  ;;  %v2472_v0 = vmax.f32 %v1788_v56, 0.0  ;;  %v2600_v1 = vmax.f32 %v2300_v57, 0.0 }
 0x213   : > { %v1809_v2 = vadd.f32 %v6650_v33, %v5696_v60  ;;  %v2321_v3 = vadd.f32 %v6650_v33, %v5824_v61  ;;  %v1800_v4 = vpop.f32.mrf.mxu0  ;;  %v2312_v5 = vpop.f32.mrf.mxu1 }
 0x214   : > { %5355 = vst [vmem:[%s6461_s28 + $0x1c8] sm:$0xff] %v4947_v62   ;;  %5419 = vst [vmem:[%s6461_s28 + $0x3c8] sm:$0xff] %v5267_v63   ;;  %v4942_v6 = vpack.c.bf16 %v2472_v0, %v2471_v58  ;;  %v5262_v7 = vpack.c.bf16 %v2600_v1, %v2599_v59  ;;  %v1801_v8 = vadd.f32 %v6650_v33, %v1800_v4 }
 0x215   : > { %v2313_v9 = vadd.f32 %v6650_v33, %v2312_v5  ;;  %v5697_v10 = vpop.f32.mrf.mxu0  ;;  %v5825_v11 = vpop.f32.mrf.mxu1  ;;  %v2477_v14 = vmax.f32 %v1809_v2, 0.0  ;;  %v2605_v15 = vmax.f32 %v2321_v3, 0.0 }
 0x216   : > { %5354 = vst [vmem:[%s6461_s28 + $0x1c0] sm:$0xff] %v4942_v6   ;;  %5418 = vst [vmem:[%s6461_s28 + $0x3c0] sm:$0xff] %v5262_v7   ;;  %v1812_v12 = vadd.f32 %v6650_v33, %v5697_v10  ;;  %v2324_v13 = vadd.f32 %v6650_v33, %v5825_v11  ;;  %v2475_v22 = vmax.f32 %v1801_v8, 0.0 }
 0x217   : > { %v1803_v16 = vpop.f32.mrf.mxu0  ;;  %v2315_v17 = vpop.f32.mrf.mxu1  ;;  %v2603_v23 = vmax.f32 %v2313_v9, 0.0 }
 0x218   : > { %v2478_v18 = vmax.f32 %v1812_v12, 0.0  ;;  %v2606_v19 = vmax.f32 %v2324_v13, 0.0  ;;  %v1804_v20 = vadd.f32 %v6650_v33, %v1803_v16  ;;  %v2316_v21 = vadd.f32 %v6650_v33, %v2315_v17 }
 0x219   : > { %v5700_v24 = vpop.f32.mrf.mxu0  ;;  %v5828_v25 = vpop.f32.mrf.mxu1 }
 0x21a   : > { %v4957_v26 = vpack.c.bf16 %v2478_v18, %v2477_v14  ;;  %v5277_v27 = vpack.c.bf16 %v2606_v19, %v2605_v15  ;;  %v2476_v28 = vmax.f32 %v1804_v20, 0.0  ;;  %v2604_v29 = vmax.f32 %v2316_v21, 0.0 }
 0x21b   : > { %v1825_v30 = vadd.f32 %v6650_v33, %v5700_v24  ;;  %v2337_v31 = vadd.f32 %v6650_v33, %v5828_v25  ;;  %v1816_v32 = vpop.f32.mrf.mxu0  ;;  %v2328_v34 = vpop.f32.mrf.mxu1 }
 0x21c   : > { %5357 = vst [vmem:[%s6461_s28 + $0x1d8] sm:$0xff] %v4957_v26   ;;  %5421 = vst [vmem:[%s6461_s28 + $0x3d8] sm:$0xff] %v5277_v27   ;;  %v4952_v35 = vpack.c.bf16 %v2476_v28, %v2475_v22  ;;  %v5272_v36 = vpack.c.bf16 %v2604_v29, %v2603_v23  ;;  %v1817_v37 = vadd.f32 %v6650_v33, %v1816_v32 }
 0x21d   : > { %v2329_v38 = vadd.f32 %v6650_v33, %v2328_v34  ;;  %v5701_v39 = vpop.f32.mrf.mxu0  ;;  %v5829_v40 = vpop.f32.mrf.mxu1  ;;  %v2481_v43 = vmax.f32 %v1825_v30, 0.0  ;;  %v2609_v44 = vmax.f32 %v2337_v31, 0.0 }
 0x21e   : > { %5356 = vst [vmem:[%s6461_s28 + $0x1d0] sm:$0xff] %v4952_v35   ;;  %5420 = vst [vmem:[%s6461_s28 + $0x3d0] sm:$0xff] %v5272_v36   ;;  %v1828_v41 = vadd.f32 %v6048_v46, %v5701_v39  ;;  %v2340_v42 = vadd.f32 %v6048_v46, %v5829_v40  ;;  %v2479_v51 = vmax.f32 %v1817_v37, 0.0 }
 0x21f   : > { %v1819_v45 = vpop.f32.mrf.mxu0  ;;  %v2331_v47 = vpop.f32.mrf.mxu1  ;;  %v2607_v52 = vmax.f32 %v2329_v38, 0.0 }
 0x220   : > { %v2482_v48 = vmax.f32 %v1828_v41, 0.0  ;;  %v2610_v49 = vmax.f32 %v2340_v42, 0.0  ;;  %v1820_v50 = vadd.f32 %v6048_v46, %v1819_v45  ;;  %v2332_v33 = vadd.f32 %v6048_v46, %v2331_v47 }
 0x221   : > { %v5704_v53 = vpop.f32.mrf.mxu0  ;;  %v5832_v54 = vpop.f32.mrf.mxu1 }
 0x222   : > { %v4967_v55 = vpack.c.bf16 %v2482_v48, %v2481_v43  ;;  %v5287_v56 = vpack.c.bf16 %v2610_v49, %v2609_v44  ;;  %v2480_v57 = vmax.f32 %v1820_v50, 0.0  ;;  %v2608_v58 = vmax.f32 %v2332_v33, 0.0 }
 0x223   : > { %v1841_v59 = vadd.f32 %v6048_v46, %v5704_v53  ;;  %v2353_v60 = vadd.f32 %v6048_v46, %v5832_v54  ;;  %v1832_v61 = vpop.f32.mrf.mxu0  ;;  %v2344_v62 = vpop.f32.mrf.mxu1 }
 0x224   : > { %5359 = vst [vmem:[%s6461_s28 + $0x1e8] sm:$0xff] %v4967_v55   ;;  %5423 = vst [vmem:[%s6461_s28 + $0x3e8] sm:$0xff] %v5287_v56   ;;  %v4962_v63 = vpack.c.bf16 %v2480_v57, %v2479_v51  ;;  %v5282_v0 = vpack.c.bf16 %v2608_v58, %v2607_v52  ;;  %v1833_v1 = vadd.f32 %v6048_v46, %v1832_v61 }
 0x225   : > { %v2345_v2 = vadd.f32 %v6048_v46, %v2344_v62  ;;  %v5705_v3 = vpop.f32.mrf.mxu0  ;;  %v5833_v4 = vpop.f32.mrf.mxu1  ;;  %v2485_v7 = vmax.f32 %v1841_v59, 0.0  ;;  %v2613_v8 = vmax.f32 %v2353_v60, 0.0 }
 0x226   : > { %5358 = vst [vmem:[%s6461_s28 + $0x1e0] sm:$0xff] %v4962_v63   ;;  %5422 = vst [vmem:[%s6461_s28 + $0x3e0] sm:$0xff] %v5282_v0   ;;  %v1844_v5 = vadd.f32 %v6048_v46, %v5705_v3  ;;  %v2356_v6 = vadd.f32 %v6048_v46, %v5833_v4  ;;  %v2483_v15 = vmax.f32 %v1833_v1, 0.0 }
 0x227   : > { %v1835_v9 = vpop.f32.mrf.mxu0  ;;  %v2347_v10 = vpop.f32.mrf.mxu1  ;;  %v2611_v16 = vmax.f32 %v2345_v2, 0.0 }
 0x228   : > { %v2486_v11 = vmax.f32 %v1844_v5, 0.0  ;;  %v2614_v12 = vmax.f32 %v2356_v6, 0.0  ;;  %v1836_v13 = vadd.f32 %v6048_v46, %v1835_v9  ;;  %v2348_v14 = vadd.f32 %v6048_v46, %v2347_v10 }
 0x22a   : > { %v4977_v17 = vpack.c.bf16 %v2486_v11, %v2485_v7  ;;  %v5297_v18 = vpack.c.bf16 %v2614_v12, %v2613_v8  ;;  %v2484_v19 = vmax.f32 %v1836_v13, 0.0  ;;  %v2612_v20 = vmax.f32 %v2348_v14, 0.0 }
 0x22c   : > { %5361 = vst [vmem:[%s6461_s28 + $0x1f8] sm:$0xff] %v4977_v17   ;;  %5425 = vst [vmem:[%s6461_s28 + $0x3f8] sm:$0xff] %v5297_v18   ;;  %v4972_v21 = vpack.c.bf16 %v2484_v19, %v2483_v15  ;;  %v5292_v22 = vpack.c.bf16 %v2612_v20, %v2611_v16 }
 0x22e   : > { %5360 = vst [vmem:[%s6461_s28 + $0x1f0] sm:$0xff] %v4972_v21   ;;  %5424 = vst [vmem:[%s6461_s28 + $0x3f0] sm:$0xff] %v5292_v22  }
 0x22f   : > { %6116 = shalt.err (!%p6113_p0)
}
 0x230   : > { %s6117_s23 = scalar_lea.hbm %s6856_s10, 16384  ;;  %s6121_s28 = scalar_lea.hbm %s6908_s3, 32768 }
 0x231   : > { %p6118_p5 = scmp.ne.s32.totalorder %s6856_s10, %s6117_s23  ;;  %p6122_p4 = scmp.lt.s32.totalorder %s6856_s10, %s6908_s3 }
 0x232   : > { %p6123_p6 = scmp.lt.s32.totalorder %s6121_s28, %s6117_s23 }
 0x233   : > { %p6119_p2 = pnand %p6118_p5, %p6924_p11 }
 0x234   : > { %p6124_p8 = por %p6123_p6, %p6122_p4 }
 0x235   : > { %p6120_p1 = pneg %p6119_p2 }
 0x237   : > { %p6125_p3 = pnand %p6124_p8, %p6120_p1 }
 0x239   : > { %6128 = shalt.err (!%p6125_p3)
}
 0x23a   : > { %s6178_s22 = smov 64   ;;  %s6179_s25 = smov 4  }
 0x23b   : > { %5856 = dma.vmem_to_hbm [thread:$0]  (%p6924_p11), %s6858_s8, 16384, %s6856_s10, %s3896_s16, %s6178_s22, %s6178_s22, %s6179_s25  }
 0x23c PF: > { %s3924_s4 = sand.u32 1, %s6159_s12   ;;  %p6925_p7 = scmp.ne.s32.totalorder %s6914_s19, 0 }
 0x23d   : > { %p6926_p9 = scmp.ge.s32.totalorder %s6171_s15, 2  ;;  %s3925_s9 = scalar_lea.sflag [#allocation4], %s3924_s4 }
 0x23f   : > { %p5867_p10 = pnand %p6926_p9, %p6925_p7 }
 0x241   : > { %p5868_p12 = pneg %p5867_p10 }
 0x243   : > { %6154 = dma.done.wait (%p5868_p12), %s3925_s9, 16384  }
 0x244   : > { %6156 = vsyncadd (%p5868_p12), %s3925_s9, 4294950912  ;;  %p17_p13 = scmp.ge.s32.totalorder %s6254_s24, 4   ;;  %s6927_s12 = smov %s6163_s13 }
 0x245   : > { %s6928_s13 = smov %s6167_s14  ;;  %s6929_s14 = smov %s6274_s5 }
 0x246   : > { %s6930_s15 = smov %s6254_s24  ;;  %19 = sbr.rel (!%p17_p13) target bundleno = 6 (0x6), region = 81 }
 0x24b   :  { %3930 = vsyncpa [#allocation3], 1 }
 0x24c   :  { %3932 = vsyncpa [#allocation3 + $0x1], 1 }
 0x24d   :  { %3933 = vsyncpa [#allocation6], 1 }
 0x24e   :  { %3934 = vsyncpa [#allocation4], 1 }
 0x24f   :  { %3936 = vsyncpa [#allocation4 + $0x1], 1 }

</bundles_post_ra>
